<compile_context>
chip_gen: v5e
topology: v5e:2x2
jax: 0.10.0
libtpu: 0.0.40
codegen_flags: <defaults>
</compile_context>

<pallas_src>
import jax
import jax.numpy as jnp
from jax.experimental import pallas as pl
from jax.experimental.pallas import tpu as pltpu

# ---- small synthetic model config -------------------------------------------------
B = 2          # number of prompts (batch)
S = 8          # context length (sequence)
D = 32         # transformer width
H = 4          # attention heads
DH = D // H    # head dim
DFF = 4 * D    # MLP hidden dim
P = 32         # text projection output dim
NLAYERS = 2    # transformer layers
EPS = 1e-5     # LayerNorm eps
BS = B * S     # folded token axis
NEG = -1e9     # large finite negative instead of -inf (NaN-safe with padding masks)
LANES = 128    # lane width of the packed slabs

# Safe to skip for this synthetic config (tiny scores, exp(-1e9) == 0.0 exactly);
# set True when running with real CLIP weights / arbitrary score magnitudes.
SUBTRACT_MAX = False

# ---- aux slab row layout (all f32, LANES columns, zero padded) ---------------------
ROW_POS = 0                                   # [0, BS)        : pos tiled, cols 0:D
ROW_MASK = BS                                 # [BS, 2BS)      : causal mask, cols 0:BS
ROW_LAYER0 = 2 * BS                           # 8 rows per layer (see pack_params)
LAYER_ROWS = 8
ROW_LNF = ROW_LAYER0 + LAYER_ROWS * NLAYERS   # lnf_w ; +1: lnf_b
ROW_PROJ = ((ROW_LNF + 2 + 7) // 8) * 8       # proj rows (8-aligned), cols 0:P
AUX_ROWS = ROW_PROJ + D

# ---- weight slab row layout (bf16, LANES columns, zero padded), per layer ----------
#   [0, D)        : wqkv (D, 3D)   -- Q columns pre-scaled by 1/sqrt(DH)
#   [D, 2D)       : wo   (D, D)
#   [2D, 3D)      : wfc  (D, DFF)
#   [3D, 3D+DFF)  : wpr  (DFF, D)
W_ROWS = 3 * D + DFF


# ---- shared helper (works inside the kernel and in the pure-JAX reference) ---------
def _layernorm(x, w, b):
    mu = jnp.mean(x, axis=-1, keepdims=True)
    xc = x - mu
    var = jnp.mean(xc * xc, axis=-1, keepdims=True)
    return xc * jax.lax.rsqrt(var + EPS) * w + b


def _bf(x):
    return x.astype(jnp.bfloat16)


# ---- the single fused kernel --------------------------------------------------------
def encoder_kernel(x_ref, onehot_ref, aux_ref, w_ref, o_ref):
    # x = prompts + positional_embedding, batch folded into rows: (B*S, D)
    x = x_ref[...] + aux_ref[ROW_POS:ROW_POS + BS, 0:D]
    mask = aux_ref[ROW_MASK:ROW_MASK + BS, 0:BS]          # (B*S, B*S) block-diag causal

    for l in range(NLAYERS):                              # static unroll over layers
        base = ROW_LAYER0 + l * LAYER_ROWS
        ln1w = aux_ref[base + 0:base + 1, 0:D]
        ln1b = aux_ref[base + 1:base + 2, 0:D]
        bqkv = aux_ref[base + 2:base + 3, :]              # (1, 128), Q part pre-scaled
        bo   = aux_ref[base + 3:base + 4, 0:D]
        ln2w = aux_ref[base + 4:base + 5, 0:D]
        ln2b = aux_ref[base + 5:base + 6, 0:D]
        bfc  = aux_ref[base + 6:base + 7, :]              # (1, 128) == (1, DFF)
        bpr  = aux_ref[base + 7:base + 8, 0:D]

        wbase = l * W_ROWS
        wqkv = w_ref[wbase:wbase + D, :]                  # (D, 128) bf16 (cols 3D: zero)
        wo   = w_ref[wbase + D:wbase + 2 * D, 0:D]        # (D, D)   bf16
        wfc  = w_ref[wbase + 2 * D:wbase + 3 * D, :]      # (D, DFF) bf16
        wpr  = w_ref[wbase + 3 * D:wbase + 3 * D + DFF, 0:D]  # (DFF, D) bf16

        # ---- multi-head causal self attention (pre-LN) ----
        xn = _layernorm(x, ln1w, ln1b)
        qkv = jnp.dot(_bf(xn), wqkv,
                      preferred_element_type=jnp.float32) + bqkv     # (BS, 128) f32
        hvs = []
        for h in range(H):                                 # static unroll over heads
            q = qkv[:, h * DH:(h + 1) * DH]                # (BS, DH), scale folded in
            k = qkv[:, D + h * DH:D + (h + 1) * DH]        # (BS, DH)
            v = qkv[:, 2 * D + h * DH:2 * D + (h + 1) * DH]
            # scores = q @ k^T without materializing a transpose (bf16 in, f32 acc)
            s = jax.lax.dot_general(_bf(q), _bf(k), (((1,), (1,)), ((), ())),
                                    preferred_element_type=jnp.float32)
            s = s + mask
            if SUBTRACT_MAX:
                s = s - jnp.max(s, axis=-1, keepdims=True)
            e = jnp.exp(s)
            p = e * pl.reciprocal(jnp.sum(e, axis=-1, keepdims=True), approx=True)
            hvs.append(jnp.dot(_bf(p), _bf(v),
                               preferred_element_type=jnp.float32))   # (BS, DH)
        # merge heads once, single output-projection matmul (no per-head wo dots)
        hv_all = jnp.concatenate(hvs, axis=-1)             # (BS, D)
        att = jnp.dot(_bf(hv_all), wo, preferred_element_type=jnp.float32)
        x = x + att + bo

        # ---- MLP: c_fc -> QuickGELU -> c_proj (pre-LN) ----
        xn = _layernorm(x, ln2w, ln2b)
        hdn = jnp.dot(_bf(xn), wfc, preferred_element_type=jnp.float32) + bfc
        hdn = hdn * jax.nn.sigmoid(1.702 * hdn)            # QuickGELU (f32, VPU/EUP)
        x = x + jnp.dot(_bf(hdn), wpr, preferred_element_type=jnp.float32) + bpr

    # ---- EOT gather (one-hot matmul) + ln_final + text projection ----
    rows = jnp.dot(_bf(onehot_ref[...]), _bf(x),
                   preferred_element_type=jnp.float32)      # (B, D)
    rows = _layernorm(rows,
                      aux_ref[ROW_LNF:ROW_LNF + 1, 0:D],
                      aux_ref[ROW_LNF + 1:ROW_LNF + 2, 0:D])
    proj = aux_ref[ROW_PROJ:ROW_PROJ + D, 0:P]
    o_ref[...] = jnp.dot(_bf(rows), _bf(proj),
                         preferred_element_type=jnp.float32).astype(o_ref.dtype)


# ---- wrapper: one grid-less pallas_call, everything resident in VMEM ----------------
# TODO(synk): on v7x (2 TCs) a grid=(B,) with dimension_semantics=("parallel",) and
# per-prompt BlockSpecs would use both cores; for real CLIP dims (D=512, 12 layers)
# add a layer grid axis that streams bf16 weight slabs instead of full residency.
@jax.jit
def text_encoder(prompts, tokenized_prompts, packed):
    x0 = prompts.reshape(BS, D)
    # EOT position per prompt -> one-hot row selector over the folded token axis
    eot = jnp.argmax(tokenized_prompts, axis=-1).astype(jnp.int32)
    onehot = jax.nn.one_hot(eot + jnp.arange(B, dtype=jnp.int32) * S,
                            BS, dtype=jnp.float32)          # (B, B*S)

    vmem_spec = pl.BlockSpec(memory_space=pltpu.MemorySpace.VMEM)
    return pl.pallas_call(
        encoder_kernel,
        out_shape=jax.ShapeDtypeStruct((B, P), jnp.float32),
        in_specs=[vmem_spec, vmem_spec, vmem_spec, vmem_spec],
        out_specs=vmem_spec,
        compiler_params=pltpu.CompilerParams(vmem_limit_bytes=32 * 1024 * 1024),
    )(x0, onehot, packed["aux"], packed["w"])


# ---- pure-JAX reference (same math, f32 everywhere, exact softmax divide) -----------
def text_encoder_ref(prompts, tokenized_prompts, params):
    x = prompts.reshape(BS, D) + jnp.tile(params["pos"], (B, 1))
    scale = 1.0 / (DH ** 0.5)
    for l in range(NLAYERS):
        xn = _layernorm(x, params["ln1_w"][l], params["ln1_b"][l])
        qkv = xn @ params["wqkv"][l] + params["bqkv"][l]
        att = jnp.zeros((BS, D), jnp.float32)
        for h in range(H):
            q = qkv[:, h * DH:(h + 1) * DH]
            k = qkv[:, D + h * DH:D + (h + 1) * DH]
            v = qkv[:, 2 * D + h * DH:2 * D + (h + 1) * DH]
            s = q @ k.T * scale + params["mask"]
            p = jax.nn.softmax(s, axis=-1)
            att = att + (p @ v) @ params["wo"][l][h * DH:(h + 1) * DH, :]
        x = x + att + params["bo"][l]
        xn = _layernorm(x, params["ln2_w"][l], params["ln2_b"][l])
        hdn = xn @ params["wfc"][l] + params["bfc"][l]
        hdn = hdn * jax.nn.sigmoid(1.702 * hdn)
        x = x + hdn @ params["wpr"][l] + params["bpr"][l]
    eot = jnp.argmax(tokenized_prompts, axis=-1) + jnp.arange(B) * S
    rows = _layernorm(x[eot], params["lnf_w"], params["lnf_b"])
    return rows @ params["proj"]


# ---- deterministic synthetic parameters ---------------------------------------------
def make_params(key):
    def nrm(k, shape, scale=0.02):
        return scale * jax.random.normal(k, shape, dtype=jnp.float32)

    keys = jax.random.split(key, 2 + 6 * NLAYERS)
    wqkv, bqkv, wo, bo, wfc, wpr = [], [], [], [], [], []
    for i in range(NLAYERS):
        k = keys[2 + 6 * i: 2 + 6 * (i + 1)]
        wqkv.append(nrm(k[0], (D, 3 * D)))
        bqkv.append(nrm(k[1], (1, 3 * D)))
        wo.append(nrm(k[2], (D, D)))
        bo.append(nrm(k[3], (1, D)))
        wfc.append(nrm(k[4], (D, DFF)))
        wpr.append(nrm(k[5], (DFF, D)))

    # block-diagonal causal mask over the folded (B*S) token axis:
    # allowed iff same prompt AND key position <= query position.
    idx = jnp.arange(BS)
    bi, si = idx // S, idx % S
    allowed = (bi[:, None] == bi[None, :]) & (si[None, :] <= si[:, None])
    mask = jnp.where(allowed, 0.0, NEG).astype(jnp.float32)

    return {
        "pos": nrm(keys[0], (S, D)),
        "mask": mask,
        "ln1_w": jnp.ones((NLAYERS, 1, D), jnp.float32),
        "ln1_b": jnp.zeros((NLAYERS, 1, D), jnp.float32),
        "wqkv": jnp.stack(wqkv), "bqkv": jnp.stack(bqkv),
        "wo": jnp.stack(wo), "bo": jnp.stack(bo),
        "ln2_w": jnp.ones((NLAYERS, 1, D), jnp.float32),
        "ln2_b": jnp.zeros((NLAYERS, 1, D), jnp.float32),
        "wfc": jnp.stack(wfc), "bfc": jnp.zeros((NLAYERS, 1, DFF), jnp.float32),
        "wpr": jnp.stack(wpr), "bpr": jnp.zeros((NLAYERS, 1, D), jnp.float32),
        "lnf_w": jnp.ones((1, D), jnp.float32),
        "lnf_b": jnp.zeros((1, D), jnp.float32),
        "proj": nrm(keys[1], (D, P)),
    }


# ---- pack reference params into the two kernel slabs --------------------------------
def pack_params(params):
    scale = 1.0 / (DH ** 0.5)
    # fold the softmax scale into the Q columns of wqkv (and bqkv)
    col_scale = jnp.concatenate(
        [jnp.full((D,), scale, jnp.float32), jnp.ones((2 * D,), jnp.float32)])

    def pad_cols(a):
        return jnp.pad(a, ((0, 0), (0, LANES - a.shape[1])))

    # bf16 weight slab: (NLAYERS * W_ROWS, 128)
    w_rows = []
    for l in range(NLAYERS):
        w_rows += [
            pad_cols(params["wqkv"][l] * col_scale[None, :]),   # (D, 128)
            pad_cols(params["wo"][l]),                          # (D, 128)
            pad_cols(params["wfc"][l]),                         # (D, 128)
            pad_cols(params["wpr"][l]),                         # (DFF, 128)
        ]
    w = jnp.concatenate(w_rows, axis=0).astype(jnp.bfloat16)

    # f32 aux slab: pos (pre-tiled), mask, all biases / LN params, ln_final, proj
    aux = jnp.zeros((AUX_ROWS, LANES), jnp.float32)
    aux = aux.at[ROW_POS:ROW_POS + BS, 0:D].set(jnp.tile(params["pos"], (B, 1)))
    aux = aux.at[ROW_MASK:ROW_MASK + BS, 0:BS].set(params["mask"])
    for l in range(NLAYERS):
        base = ROW_LAYER0 + l * LAYER_ROWS
        aux = aux.at[base + 0, 0:D].set(params["ln1_w"][l, 0])
        aux = aux.at[base + 1, 0:D].set(params["ln1_b"][l, 0])
        aux = aux.at[base + 2, 0:3 * D].set(params["bqkv"][l, 0] * col_scale)
        aux = aux.at[base + 3, 0:D].set(params["bo"][l, 0])
        aux = aux.at[base + 4, 0:D].set(params["ln2_w"][l, 0])
        aux = aux.at[base + 5, 0:D].set(params["ln2_b"][l, 0])
        aux = aux.at[base + 6, 0:DFF].set(params["bfc"][l, 0])
        aux = aux.at[base + 7, 0:D].set(params["bpr"][l, 0])
    aux = aux.at[ROW_LNF, 0:D].set(params["lnf_w"][0])
    aux = aux.at[ROW_LNF + 1, 0:D].set(params["lnf_b"][0])
    aux = aux.at[ROW_PROJ:ROW_PROJ + D, 0:P].set(params["proj"])
    return {"aux": aux, "w": w}


if __name__ == "__main__":
    key = jax.random.PRNGKey(0)
    k_prompts, k_tok, k_params = jax.random.split(key, 3)

    # prompts: learned token embeddings, (B, S, D)
    prompts = 0.02 * jax.random.normal(k_prompts, (B, S, D), dtype=jnp.float32)

    # tokenized prompts: integer ids; argmax(-1) marks the EOT position
    tokenized = jax.random.randint(k_tok, (B, S), 1, 100, dtype=jnp.int32)
    tokenized = tokenized.at[0, 5].set(1000).at[1, 7].set(1000)

    params = make_params(k_params)
    packed = pack_params(params)

    out = text_encoder(prompts, tokenized, packed)
    out = jax.block_until_ready(out)
    assert out.shape == (B, P) and out.dtype == jnp.float32

    # correctness vs pure-JAX f32 reference (loose tol: bf16 MXU operands +
    # approximate reciprocal in the softmax denominator)
    ref = jax.block_until_ready(text_encoder_ref(prompts, tokenized, params))
    assert bool(jnp.all(jnp.isfinite(out)))
    assert bool(jnp.allclose(out, ref, rtol=5e-2, atol=5e-3)), "mismatch vs reference"

    print("KERNEL_OK")
</pallas_src>

<mosaic_0001>
module attributes {stable_mosaic.version = 11 : i64} {
  func.func @encoder_kernel(%arg0: memref<16x32xf32, #tpu.memory_space<vmem>>, %arg1: memref<2x16xf32, #tpu.memory_space<vmem>>, %arg2: memref<88x128xf32, #tpu.memory_space<vmem>>, %arg3: memref<448x128xbf16, #tpu.memory_space<vmem>>, %arg4: memref<2x32xf32, #tpu.memory_space<vmem>>) attributes {dimension_semantics = [], scalar_prefetch = 0 : i64, scratch_operands = 0 : i64, tpu.core_type = #tpu.core_type<tc>} {
    %c0 = arith.constant 0 : index
    %c0_0 = arith.constant 0 : index
    %0 = vector.load %arg0[%c0, %c0_0] : memref<16x32xf32, #tpu.memory_space<vmem>>, vector<16x32xf32>
    %c0_1 = arith.constant 0 : index
    %c0_2 = arith.constant 0 : index
    %1 = vector.load %arg2[%c0_1, %c0_2] : memref<88x128xf32, #tpu.memory_space<vmem>>, vector<16x32xf32>
    %2 = arith.addf %0, %1 : vector<16x32xf32>
    %c16 = arith.constant 16 : index
    %c0_3 = arith.constant 0 : index
    %3 = vector.load %arg2[%c16, %c0_3] : memref<88x128xf32, #tpu.memory_space<vmem>>, vector<16x16xf32>
    %c32 = arith.constant 32 : index
    %c0_4 = arith.constant 0 : index
    %4 = vector.load %arg2[%c32, %c0_4] : memref<88x128xf32, #tpu.memory_space<vmem>>, vector<1x32xf32>
    %c33 = arith.constant 33 : index
    %c0_5 = arith.constant 0 : index
    %5 = vector.load %arg2[%c33, %c0_5] : memref<88x128xf32, #tpu.memory_space<vmem>>, vector<1x32xf32>
    %c34 = arith.constant 34 : index
    %c0_6 = arith.constant 0 : index
    %6 = vector.load %arg2[%c34, %c0_6] : memref<88x128xf32, #tpu.memory_space<vmem>>, vector<1x128xf32>
    %c35 = arith.constant 35 : index
    %c0_7 = arith.constant 0 : index
    %7 = vector.load %arg2[%c35, %c0_7] : memref<88x128xf32, #tpu.memory_space<vmem>>, vector<1x32xf32>
    %c36 = arith.constant 36 : index
    %c0_8 = arith.constant 0 : index
    %8 = vector.load %arg2[%c36, %c0_8] : memref<88x128xf32, #tpu.memory_space<vmem>>, vector<1x32xf32>
    %c37 = arith.constant 37 : index
    %c0_9 = arith.constant 0 : index
    %9 = vector.load %arg2[%c37, %c0_9] : memref<88x128xf32, #tpu.memory_space<vmem>>, vector<1x32xf32>
    %c38 = arith.constant 38 : index
    %c0_10 = arith.constant 0 : index
    %10 = vector.load %arg2[%c38, %c0_10] : memref<88x128xf32, #tpu.memory_space<vmem>>, vector<1x128xf32>
    %c39 = arith.constant 39 : index
    %c0_11 = arith.constant 0 : index
    %11 = vector.load %arg2[%c39, %c0_11] : memref<88x128xf32, #tpu.memory_space<vmem>>, vector<1x32xf32>
    %c0_12 = arith.constant 0 : index
    %c0_13 = arith.constant 0 : index
    %12 = vector.load %arg3[%c0_12, %c0_13] : memref<448x128xbf16, #tpu.memory_space<vmem>>, vector<32x128xbf16>
    %c32_14 = arith.constant 32 : index
    %c0_15 = arith.constant 0 : index
    %13 = vector.load %arg3[%c32_14, %c0_15] : memref<448x128xbf16, #tpu.memory_space<vmem>>, vector<32x32xbf16>
    %c64 = arith.constant 64 : index
    %c0_16 = arith.constant 0 : index
    %14 = vector.load %arg3[%c64, %c0_16] : memref<448x128xbf16, #tpu.memory_space<vmem>>, vector<32x128xbf16>
    %c96 = arith.constant 96 : index
    %c0_17 = arith.constant 0 : index
    %15 = vector.load %arg3[%c96, %c0_17] : memref<448x128xbf16, #tpu.memory_space<vmem>>, vector<128x32xbf16>
    %cst = arith.constant dense<0.000000e+00> : vector<16xf32>
    %16 = vector.multi_reduction <add>, %2, %cst [1] : vector<16x32xf32> to vector<16xf32>
    %17 = vector.shape_cast %16 : vector<16xf32> to vector<16x1xf32>
    %cst_18 = arith.constant 3.200000e+01 : f32
    %18 = vector.broadcast %cst_18 : f32 to vector<16x1xf32>
    %19 = arith.divf %17, %18 : vector<16x1xf32>
    %20 = vector.broadcast %19 : vector<16x1xf32> to vector<16x32xf32>
    %21 = arith.subf %2, %20 : vector<16x32xf32>
    %22 = arith.mulf %21, %21 : vector<16x32xf32>
    %cst_19 = arith.constant dense<0.000000e+00> : vector<16xf32>
    %23 = vector.multi_reduction <add>, %22, %cst_19 [1] : vector<16x32xf32> to vector<16xf32>
    %24 = vector.shape_cast %23 : vector<16xf32> to vector<16x1xf32>
    %cst_20 = arith.constant 3.200000e+01 : f32
    %25 = vector.broadcast %cst_20 : f32 to vector<16x1xf32>
    %26 = arith.divf %24, %25 : vector<16x1xf32>
    %cst_21 = arith.constant 9.99999974E-6 : f32
    %27 = vector.broadcast %cst_21 : f32 to vector<16x1xf32>
    %28 = arith.addf %26, %27 : vector<16x1xf32>
    %29 = math.rsqrt %28 : vector<16x1xf32>
    %30 = vector.broadcast %29 : vector<16x1xf32> to vector<16x32xf32>
    %31 = arith.mulf %21, %30 : vector<16x32xf32>
    %32 = vector.broadcast %4 : vector<1x32xf32> to vector<16x32xf32>
    %33 = arith.mulf %31, %32 : vector<16x32xf32>
    %34 = vector.broadcast %5 : vector<1x32xf32> to vector<16x32xf32>
    %35 = arith.addf %33, %34 : vector<16x32xf32>
    %36 = arith.truncf %35 : vector<16x32xf32> to vector<16x32xbf16>
    %cst_22 = arith.constant dense<0.000000e+00> : vector<16x128xf32>
    %37 = tpu.matmul %36, %12, %cst_22 {dimension_numbers = #tpu.dot_dimension_numbers<[1], [0], [0], [1], [0, 0, 1, 1], [], []>} : vector<16x32xbf16>, vector<32x128xbf16>, vector<16x128xf32> -> vector<16x128xf32>
    %38 = vector.broadcast %6 : vector<1x128xf32> to vector<16x128xf32>
    %39 = arith.addf %37, %38 : vector<16x128xf32>
    %40 = vector.extract_strided_slice %39 {offsets = [0, 0], sizes = [16, 8], strides = [1, 1]} : vector<16x128xf32> to vector<16x8xf32>
    %41 = vector.extract_strided_slice %39 {offsets = [0, 32], sizes = [16, 8], strides = [1, 1]} : vector<16x128xf32> to vector<16x8xf32>
    %42 = vector.extract_strided_slice %39 {offsets = [0, 64], sizes = [16, 8], strides = [1, 1]} : vector<16x128xf32> to vector<16x8xf32>
    %43 = arith.truncf %40 : vector<16x8xf32> to vector<16x8xbf16>
    %44 = arith.truncf %41 : vector<16x8xf32> to vector<16x8xbf16>
    %cst_23 = arith.constant dense<0.000000e+00> : vector<16x16xf32>
    %45 = tpu.matmul %43, %44, %cst_23 {dimension_numbers = #tpu.dot_dimension_numbers<[1], [1], [0], [0], [0, 0, 1, 0], [], []>} : vector<16x8xbf16>, vector<16x8xbf16>, vector<16x16xf32> -> vector<16x16xf32>
    %46 = arith.addf %45, %3 : vector<16x16xf32>
    %47 = math.exp %46 : vector<16x16xf32>
    %cst_24 = arith.constant dense<0.000000e+00> : vector<16xf32>
    %48 = vector.multi_reduction <add>, %47, %cst_24 [1] : vector<16x16xf32> to vector<16xf32>
    %49 = vector.shape_cast %48 : vector<16xf32> to vector<16x1xf32>
    %50 = tpu.reciprocal %49 {approx = true} : vector<16x1xf32> -> vector<16x1xf32>
    %51 = vector.broadcast %50 : vector<16x1xf32> to vector<16x16xf32>
    %52 = arith.mulf %47, %51 : vector<16x16xf32>
    %53 = arith.truncf %52 : vector<16x16xf32> to vector<16x16xbf16>
    %54 = arith.truncf %42 : vector<16x8xf32> to vector<16x8xbf16>
    %cst_25 = arith.constant dense<0.000000e+00> : vector<16x8xf32>
    %55 = tpu.matmul %53, %54, %cst_25 {dimension_numbers = #tpu.dot_dimension_numbers<[1], [0], [0], [1], [0, 0, 1, 1], [], []>} : vector<16x16xbf16>, vector<16x8xbf16>, vector<16x8xf32> -> vector<16x8xf32>
    %56 = vector.extract_strided_slice %39 {offsets = [0, 8], sizes = [16, 8], strides = [1, 1]} : vector<16x128xf32> to vector<16x8xf32>
    %57 = vector.extract_strided_slice %39 {offsets = [0, 40], sizes = [16, 8], strides = [1, 1]} : vector<16x128xf32> to vector<16x8xf32>
    %58 = vector.extract_strided_slice %39 {offsets = [0, 72], sizes = [16, 8], strides = [1, 1]} : vector<16x128xf32> to vector<16x8xf32>
    %59 = arith.truncf %56 : vector<16x8xf32> to vector<16x8xbf16>
    %60 = arith.truncf %57 : vector<16x8xf32> to vector<16x8xbf16>
    %cst_26 = arith.constant dense<0.000000e+00> : vector<16x16xf32>
    %61 = tpu.matmul %59, %60, %cst_26 {dimension_numbers = #tpu.dot_dimension_numbers<[1], [1], [0], [0], [0, 0, 1, 0], [], []>} : vector<16x8xbf16>, vector<16x8xbf16>, vector<16x16xf32> -> vector<16x16xf32>
    %62 = arith.addf %61, %3 : vector<16x16xf32>
    %63 = math.exp %62 : vector<16x16xf32>
    %cst_27 = arith.constant dense<0.000000e+00> : vector<16xf32>
    %64 = vector.multi_reduction <add>, %63, %cst_27 [1] : vector<16x16xf32> to vector<16xf32>
    %65 = vector.shape_cast %64 : vector<16xf32> to vector<16x1xf32>
    %66 = tpu.reciprocal %65 {approx = true} : vector<16x1xf32> -> vector<16x1xf32>
    %67 = vector.broadcast %66 : vector<16x1xf32> to vector<16x16xf32>
    %68 = arith.mulf %63, %67 : vector<16x16xf32>
    %69 = arith.truncf %68 : vector<16x16xf32> to vector<16x16xbf16>
    %70 = arith.truncf %58 : vector<16x8xf32> to vector<16x8xbf16>
    %cst_28 = arith.constant dense<0.000000e+00> : vector<16x8xf32>
    %71 = tpu.matmul %69, %70, %cst_28 {dimension_numbers = #tpu.dot_dimension_numbers<[1], [0], [0], [1], [0, 0, 1, 1], [], []>} : vector<16x16xbf16>, vector<16x8xbf16>, vector<16x8xf32> -> vector<16x8xf32>
    %72 = vector.extract_strided_slice %39 {offsets = [0, 16], sizes = [16, 8], strides = [1, 1]} : vector<16x128xf32> to vector<16x8xf32>
    %73 = vector.extract_strided_slice %39 {offsets = [0, 48], sizes = [16, 8], strides = [1, 1]} : vector<16x128xf32> to vector<16x8xf32>
    %74 = vector.extract_strided_slice %39 {offsets = [0, 80], sizes = [16, 8], strides = [1, 1]} : vector<16x128xf32> to vector<16x8xf32>
    %75 = arith.truncf %72 : vector<16x8xf32> to vector<16x8xbf16>
    %76 = arith.truncf %73 : vector<16x8xf32> to vector<16x8xbf16>
    %cst_29 = arith.constant dense<0.000000e+00> : vector<16x16xf32>
    %77 = tpu.matmul %75, %76, %cst_29 {dimension_numbers = #tpu.dot_dimension_numbers<[1], [1], [0], [0], [0, 0, 1, 0], [], []>} : vector<16x8xbf16>, vector<16x8xbf16>, vector<16x16xf32> -> vector<16x16xf32>
    %78 = arith.addf %77, %3 : vector<16x16xf32>
    %79 = math.exp %78 : vector<16x16xf32>
    %cst_30 = arith.constant dense<0.000000e+00> : vector<16xf32>
    %80 = vector.multi_reduction <add>, %79, %cst_30 [1] : vector<16x16xf32> to vector<16xf32>
    %81 = vector.shape_cast %80 : vector<16xf32> to vector<16x1xf32>
    %82 = tpu.reciprocal %81 {approx = true} : vector<16x1xf32> -> vector<16x1xf32>
    %83 = vector.broadcast %82 : vector<16x1xf32> to vector<16x16xf32>
    %84 = arith.mulf %79, %83 : vector<16x16xf32>
    %85 = arith.truncf %84 : vector<16x16xf32> to vector<16x16xbf16>
    %86 = arith.truncf %74 : vector<16x8xf32> to vector<16x8xbf16>
    %cst_31 = arith.constant dense<0.000000e+00> : vector<16x8xf32>
    %87 = tpu.matmul %85, %86, %cst_31 {dimension_numbers = #tpu.dot_dimension_numbers<[1], [0], [0], [1], [0, 0, 1, 1], [], []>} : vector<16x16xbf16>, vector<16x8xbf16>, vector<16x8xf32> -> vector<16x8xf32>
    %88 = vector.extract_strided_slice %39 {offsets = [0, 24], sizes = [16, 8], strides = [1, 1]} : vector<16x128xf32> to vector<16x8xf32>
    %89 = vector.extract_strided_slice %39 {offsets = [0, 56], sizes = [16, 8], strides = [1, 1]} : vector<16x128xf32> to vector<16x8xf32>
    %90 = vector.extract_strided_slice %39 {offsets = [0, 88], sizes = [16, 8], strides = [1, 1]} : vector<16x128xf32> to vector<16x8xf32>
    %91 = arith.truncf %88 : vector<16x8xf32> to vector<16x8xbf16>
    %92 = arith.truncf %89 : vector<16x8xf32> to vector<16x8xbf16>
    %cst_32 = arith.constant dense<0.000000e+00> : vector<16x16xf32>
    %93 = tpu.matmul %91, %92, %cst_32 {dimension_numbers = #tpu.dot_dimension_numbers<[1], [1], [0], [0], [0, 0, 1, 0], [], []>} : vector<16x8xbf16>, vector<16x8xbf16>, vector<16x16xf32> -> vector<16x16xf32>
    %94 = arith.addf %93, %3 : vector<16x16xf32>
    %95 = math.exp %94 : vector<16x16xf32>
    %cst_33 = arith.constant dense<0.000000e+00> : vector<16xf32>
    %96 = vector.multi_reduction <add>, %95, %cst_33 [1] : vector<16x16xf32> to vector<16xf32>
    %97 = vector.shape_cast %96 : vector<16xf32> to vector<16x1xf32>
    %98 = tpu.reciprocal %97 {approx = true} : vector<16x1xf32> -> vector<16x1xf32>
    %99 = vector.broadcast %98 : vector<16x1xf32> to vector<16x16xf32>
    %100 = arith.mulf %95, %99 : vector<16x16xf32>
    %101 = arith.truncf %100 : vector<16x16xf32> to vector<16x16xbf16>
    %102 = arith.truncf %90 : vector<16x8xf32> to vector<16x8xbf16>
    %cst_34 = arith.constant dense<0.000000e+00> : vector<16x8xf32>
    %103 = tpu.matmul %101, %102, %cst_34 {dimension_numbers = #tpu.dot_dimension_numbers<[1], [0], [0], [1], [0, 0, 1, 1], [], []>} : vector<16x16xbf16>, vector<16x8xbf16>, vector<16x8xf32> -> vector<16x8xf32>
    %104 = tpu.concatenate %55, %71, %87, %103 in 1 : vector<16x8xf32>, vector<16x8xf32>, vector<16x8xf32>, vector<16x8xf32> -> vector<16x32xf32>
    %105 = arith.truncf %104 : vector<16x32xf32> to vector<16x32xbf16>
    %cst_35 = arith.constant dense<0.000000e+00> : vector<16x32xf32>
    %106 = tpu.matmul %105, %13, %cst_35 {dimension_numbers = #tpu.dot_dimension_numbers<[1], [0], [0], [1], [0, 0, 1, 1], [], []>} : vector<16x32xbf16>, vector<32x32xbf16>, vector<16x32xf32> -> vector<16x32xf32>
    %107 = arith.addf %2, %106 : vector<16x32xf32>
    %108 = vector.broadcast %7 : vector<1x32xf32> to vector<16x32xf32>
    %109 = arith.addf %107, %108 : vector<16x32xf32>
    %cst_36 = arith.constant dense<0.000000e+00> : vector<16xf32>
    %110 = vector.multi_reduction <add>, %109, %cst_36 [1] : vector<16x32xf32> to vector<16xf32>
    %111 = vector.shape_cast %110 : vector<16xf32> to vector<16x1xf32>
    %cst_37 = arith.constant 3.200000e+01 : f32
    %112 = vector.broadcast %cst_37 : f32 to vector<16x1xf32>
    %113 = arith.divf %111, %112 : vector<16x1xf32>
    %114 = vector.broadcast %113 : vector<16x1xf32> to vector<16x32xf32>
    %115 = arith.subf %109, %114 : vector<16x32xf32>
    %116 = arith.mulf %115, %115 : vector<16x32xf32>
    %cst_38 = arith.constant dense<0.000000e+00> : vector<16xf32>
    %117 = vector.multi_reduction <add>, %116, %cst_38 [1] : vector<16x32xf32> to vector<16xf32>
    %118 = vector.shape_cast %117 : vector<16xf32> to vector<16x1xf32>
    %cst_39 = arith.constant 3.200000e+01 : f32
    %119 = vector.broadcast %cst_39 : f32 to vector<16x1xf32>
    %120 = arith.divf %118, %119 : vector<16x1xf32>
    %cst_40 = arith.constant 9.99999974E-6 : f32
    %121 = vector.broadcast %cst_40 : f32 to vector<16x1xf32>
    %122 = arith.addf %120, %121 : vector<16x1xf32>
    %123 = math.rsqrt %122 : vector<16x1xf32>
    %124 = vector.broadcast %123 : vector<16x1xf32> to vector<16x32xf32>
    %125 = arith.mulf %115, %124 : vector<16x32xf32>
    %126 = vector.broadcast %8 : vector<1x32xf32> to vector<16x32xf32>
    %127 = arith.mulf %125, %126 : vector<16x32xf32>
    %128 = vector.broadcast %9 : vector<1x32xf32> to vector<16x32xf32>
    %129 = arith.addf %127, %128 : vector<16x32xf32>
    %130 = arith.truncf %129 : vector<16x32xf32> to vector<16x32xbf16>
    %cst_41 = arith.constant dense<0.000000e+00> : vector<16x128xf32>
    %131 = tpu.matmul %130, %14, %cst_41 {dimension_numbers = #tpu.dot_dimension_numbers<[1], [0], [0], [1], [0, 0, 1, 1], [], []>} : vector<16x32xbf16>, vector<32x128xbf16>, vector<16x128xf32> -> vector<16x128xf32>
    %132 = vector.broadcast %10 : vector<1x128xf32> to vector<16x128xf32>
    %133 = arith.addf %131, %132 : vector<16x128xf32>
    %cst_42 = arith.constant 1.702000e+00 : f32
    %134 = vector.broadcast %cst_42 : f32 to vector<16x128xf32>
    %135 = arith.mulf %134, %133 : vector<16x128xf32>
    %136 = arith.negf %135 : vector<16x128xf32>
    %137 = math.exp %136 : vector<16x128xf32>
    %cst_43 = arith.constant 1.000000e+00 : f32
    %138 = vector.broadcast %cst_43 : f32 to vector<16x128xf32>
    %139 = arith.addf %138, %137 : vector<16x128xf32>
    %140 = arith.divf %138, %139 : vector<16x128xf32>
    %141 = arith.mulf %133, %140 : vector<16x128xf32>
    %142 = arith.truncf %141 : vector<16x128xf32> to vector<16x128xbf16>
    %cst_44 = arith.constant dense<0.000000e+00> : vector<16x32xf32>
    %143 = tpu.matmul %142, %15, %cst_44 {dimension_numbers = #tpu.dot_dimension_numbers<[1], [0], [0], [1], [0, 0, 1, 1], [], []>} : vector<16x128xbf16>, vector<128x32xbf16>, vector<16x32xf32> -> vector<16x32xf32>
    %144 = arith.addf %109, %143 : vector<16x32xf32>
    %145 = vector.broadcast %11 : vector<1x32xf32> to vector<16x32xf32>
    %146 = arith.addf %144, %145 : vector<16x32xf32>
    %c40 = arith.constant 40 : index
    %c0_45 = arith.constant 0 : index
    %147 = vector.load %arg2[%c40, %c0_45] : memref<88x128xf32, #tpu.memory_space<vmem>>, vector<1x32xf32>
    %c41 = arith.constant 41 : index
    %c0_46 = arith.constant 0 : index
    %148 = vector.load %arg2[%c41, %c0_46] : memref<88x128xf32, #tpu.memory_space<vmem>>, vector<1x32xf32>
    %c42 = arith.constant 42 : index
    %c0_47 = arith.constant 0 : index
    %149 = vector.load %arg2[%c42, %c0_47] : memref<88x128xf32, #tpu.memory_space<vmem>>, vector<1x128xf32>
    %c43 = arith.constant 43 : index
    %c0_48 = arith.constant 0 : index
    %150 = vector.load %arg2[%c43, %c0_48] : memref<88x128xf32, #tpu.memory_space<vmem>>, vector<1x32xf32>
    %c44 = arith.constant 44 : index
    %c0_49 = arith.constant 0 : index
    %151 = vector.load %arg2[%c44, %c0_49] : memref<88x128xf32, #tpu.memory_space<vmem>>, vector<1x32xf32>
    %c45 = arith.constant 45 : index
    %c0_50 = arith.constant 0 : index
    %152 = vector.load %arg2[%c45, %c0_50] : memref<88x128xf32, #tpu.memory_space<vmem>>, vector<1x32xf32>
    %c46 = arith.constant 46 : index
    %c0_51 = arith.constant 0 : index
    %153 = vector.load %arg2[%c46, %c0_51] : memref<88x128xf32, #tpu.memory_space<vmem>>, vector<1x128xf32>
    %c47 = arith.constant 47 : index
    %c0_52 = arith.constant 0 : index
    %154 = vector.load %arg2[%c47, %c0_52] : memref<88x128xf32, #tpu.memory_space<vmem>>, vector<1x32xf32>
    %c224 = arith.constant 224 : index
    %c0_53 = arith.constant 0 : index
    %155 = vector.load %arg3[%c224, %c0_53] : memref<448x128xbf16, #tpu.memory_space<vmem>>, vector<32x128xbf16>
    %c256 = arith.constant 256 : index
    %c0_54 = arith.constant 0 : index
    %156 = vector.load %arg3[%c256, %c0_54] : memref<448x128xbf16, #tpu.memory_space<vmem>>, vector<32x32xbf16>
    %c288 = arith.constant 288 : index
    %c0_55 = arith.constant 0 : index
    %157 = vector.load %arg3[%c288, %c0_55] : memref<448x128xbf16, #tpu.memory_space<vmem>>, vector<32x128xbf16>
    %c320 = arith.constant 320 : index
    %c0_56 = arith.constant 0 : index
    %158 = vector.load %arg3[%c320, %c0_56] : memref<448x128xbf16, #tpu.memory_space<vmem>>, vector<128x32xbf16>
    %cst_57 = arith.constant dense<0.000000e+00> : vector<16xf32>
    %159 = vector.multi_reduction <add>, %146, %cst_57 [1] : vector<16x32xf32> to vector<16xf32>
    %160 = vector.shape_cast %159 : vector<16xf32> to vector<16x1xf32>
    %cst_58 = arith.constant 3.200000e+01 : f32
    %161 = vector.broadcast %cst_58 : f32 to vector<16x1xf32>
    %162 = arith.divf %160, %161 : vector<16x1xf32>
    %163 = vector.broadcast %162 : vector<16x1xf32> to vector<16x32xf32>
    %164 = arith.subf %146, %163 : vector<16x32xf32>
    %165 = arith.mulf %164, %164 : vector<16x32xf32>
    %cst_59 = arith.constant dense<0.000000e+00> : vector<16xf32>
    %166 = vector.multi_reduction <add>, %165, %cst_59 [1] : vector<16x32xf32> to vector<16xf32>
    %167 = vector.shape_cast %166 : vector<16xf32> to vector<16x1xf32>
    %cst_60 = arith.constant 3.200000e+01 : f32
    %168 = vector.broadcast %cst_60 : f32 to vector<16x1xf32>
    %169 = arith.divf %167, %168 : vector<16x1xf32>
    %cst_61 = arith.constant 9.99999974E-6 : f32
    %170 = vector.broadcast %cst_61 : f32 to vector<16x1xf32>
    %171 = arith.addf %169, %170 : vector<16x1xf32>
    %172 = math.rsqrt %171 : vector<16x1xf32>
    %173 = vector.broadcast %172 : vector<16x1xf32> to vector<16x32xf32>
    %174 = arith.mulf %164, %173 : vector<16x32xf32>
    %175 = vector.broadcast %147 : vector<1x32xf32> to vector<16x32xf32>
    %176 = arith.mulf %174, %175 : vector<16x32xf32>
    %177 = vector.broadcast %148 : vector<1x32xf32> to vector<16x32xf32>
    %178 = arith.addf %176, %177 : vector<16x32xf32>
    %179 = arith.truncf %178 : vector<16x32xf32> to vector<16x32xbf16>
    %cst_62 = arith.constant dense<0.000000e+00> : vector<16x128xf32>
    %180 = tpu.matmul %179, %155, %cst_62 {dimension_numbers = #tpu.dot_dimension_numbers<[1], [0], [0], [1], [0, 0, 1, 1], [], []>} : vector<16x32xbf16>, vector<32x128xbf16>, vector<16x128xf32> -> vector<16x128xf32>
    %181 = vector.broadcast %149 : vector<1x128xf32> to vector<16x128xf32>
    %182 = arith.addf %180, %181 : vector<16x128xf32>
    %183 = vector.extract_strided_slice %182 {offsets = [0, 0], sizes = [16, 8], strides = [1, 1]} : vector<16x128xf32> to vector<16x8xf32>
    %184 = vector.extract_strided_slice %182 {offsets = [0, 32], sizes = [16, 8], strides = [1, 1]} : vector<16x128xf32> to vector<16x8xf32>
    %185 = vector.extract_strided_slice %182 {offsets = [0, 64], sizes = [16, 8], strides = [1, 1]} : vector<16x128xf32> to vector<16x8xf32>
    %186 = arith.truncf %183 : vector<16x8xf32> to vector<16x8xbf16>
    %187 = arith.truncf %184 : vector<16x8xf32> to vector<16x8xbf16>
    %cst_63 = arith.constant dense<0.000000e+00> : vector<16x16xf32>
    %188 = tpu.matmul %186, %187, %cst_63 {dimension_numbers = #tpu.dot_dimension_numbers<[1], [1], [0], [0], [0, 0, 1, 0], [], []>} : vector<16x8xbf16>, vector<16x8xbf16>, vector<16x16xf32> -> vector<16x16xf32>
    %189 = arith.addf %188, %3 : vector<16x16xf32>
    %190 = math.exp %189 : vector<16x16xf32>
    %cst_64 = arith.constant dense<0.000000e+00> : vector<16xf32>
    %191 = vector.multi_reduction <add>, %190, %cst_64 [1] : vector<16x16xf32> to vector<16xf32>
    %192 = vector.shape_cast %191 : vector<16xf32> to vector<16x1xf32>
    %193 = tpu.reciprocal %192 {approx = true} : vector<16x1xf32> -> vector<16x1xf32>
    %194 = vector.broadcast %193 : vector<16x1xf32> to vector<16x16xf32>
    %195 = arith.mulf %190, %194 : vector<16x16xf32>
    %196 = arith.truncf %195 : vector<16x16xf32> to vector<16x16xbf16>
    %197 = arith.truncf %185 : vector<16x8xf32> to vector<16x8xbf16>
    %cst_65 = arith.constant dense<0.000000e+00> : vector<16x8xf32>
    %198 = tpu.matmul %196, %197, %cst_65 {dimension_numbers = #tpu.dot_dimension_numbers<[1], [0], [0], [1], [0, 0, 1, 1], [], []>} : vector<16x16xbf16>, vector<16x8xbf16>, vector<16x8xf32> -> vector<16x8xf32>
    %199 = vector.extract_strided_slice %182 {offsets = [0, 8], sizes = [16, 8], strides = [1, 1]} : vector<16x128xf32> to vector<16x8xf32>
    %200 = vector.extract_strided_slice %182 {offsets = [0, 40], sizes = [16, 8], strides = [1, 1]} : vector<16x128xf32> to vector<16x8xf32>
    %201 = vector.extract_strided_slice %182 {offsets = [0, 72], sizes = [16, 8], strides = [1, 1]} : vector<16x128xf32> to vector<16x8xf32>
    %202 = arith.truncf %199 : vector<16x8xf32> to vector<16x8xbf16>
    %203 = arith.truncf %200 : vector<16x8xf32> to vector<16x8xbf16>
    %cst_66 = arith.constant dense<0.000000e+00> : vector<16x16xf32>
    %204 = tpu.matmul %202, %203, %cst_66 {dimension_numbers = #tpu.dot_dimension_numbers<[1], [1], [0], [0], [0, 0, 1, 0], [], []>} : vector<16x8xbf16>, vector<16x8xbf16>, vector<16x16xf32> -> vector<16x16xf32>
    %205 = arith.addf %204, %3 : vector<16x16xf32>
    %206 = math.exp %205 : vector<16x16xf32>
    %cst_67 = arith.constant dense<0.000000e+00> : vector<16xf32>
    %207 = vector.multi_reduction <add>, %206, %cst_67 [1] : vector<16x16xf32> to vector<16xf32>
    %208 = vector.shape_cast %207 : vector<16xf32> to vector<16x1xf32>
    %209 = tpu.reciprocal %208 {approx = true} : vector<16x1xf32> -> vector<16x1xf32>
    %210 = vector.broadcast %209 : vector<16x1xf32> to vector<16x16xf32>
    %211 = arith.mulf %206, %210 : vector<16x16xf32>
    %212 = arith.truncf %211 : vector<16x16xf32> to vector<16x16xbf16>
    %213 = arith.truncf %201 : vector<16x8xf32> to vector<16x8xbf16>
    %cst_68 = arith.constant dense<0.000000e+00> : vector<16x8xf32>
    %214 = tpu.matmul %212, %213, %cst_68 {dimension_numbers = #tpu.dot_dimension_numbers<[1], [0], [0], [1], [0, 0, 1, 1], [], []>} : vector<16x16xbf16>, vector<16x8xbf16>, vector<16x8xf32> -> vector<16x8xf32>
    %215 = vector.extract_strided_slice %182 {offsets = [0, 16], sizes = [16, 8], strides = [1, 1]} : vector<16x128xf32> to vector<16x8xf32>
    %216 = vector.extract_strided_slice %182 {offsets = [0, 48], sizes = [16, 8], strides = [1, 1]} : vector<16x128xf32> to vector<16x8xf32>
    %217 = vector.extract_strided_slice %182 {offsets = [0, 80], sizes = [16, 8], strides = [1, 1]} : vector<16x128xf32> to vector<16x8xf32>
    %218 = arith.truncf %215 : vector<16x8xf32> to vector<16x8xbf16>
    %219 = arith.truncf %216 : vector<16x8xf32> to vector<16x8xbf16>
    %cst_69 = arith.constant dense<0.000000e+00> : vector<16x16xf32>
    %220 = tpu.matmul %218, %219, %cst_69 {dimension_numbers = #tpu.dot_dimension_numbers<[1], [1], [0], [0], [0, 0, 1, 0], [], []>} : vector<16x8xbf16>, vector<16x8xbf16>, vector<16x16xf32> -> vector<16x16xf32>
    %221 = arith.addf %220, %3 : vector<16x16xf32>
    %222 = math.exp %221 : vector<16x16xf32>
    %cst_70 = arith.constant dense<0.000000e+00> : vector<16xf32>
    %223 = vector.multi_reduction <add>, %222, %cst_70 [1] : vector<16x16xf32> to vector<16xf32>
    %224 = vector.shape_cast %223 : vector<16xf32> to vector<16x1xf32>
    %225 = tpu.reciprocal %224 {approx = true} : vector<16x1xf32> -> vector<16x1xf32>
    %226 = vector.broadcast %225 : vector<16x1xf32> to vector<16x16xf32>
    %227 = arith.mulf %222, %226 : vector<16x16xf32>
    %228 = arith.truncf %227 : vector<16x16xf32> to vector<16x16xbf16>
    %229 = arith.truncf %217 : vector<16x8xf32> to vector<16x8xbf16>
    %cst_71 = arith.constant dense<0.000000e+00> : vector<16x8xf32>
    %230 = tpu.matmul %228, %229, %cst_71 {dimension_numbers = #tpu.dot_dimension_numbers<[1], [0], [0], [1], [0, 0, 1, 1], [], []>} : vector<16x16xbf16>, vector<16x8xbf16>, vector<16x8xf32> -> vector<16x8xf32>
    %231 = vector.extract_strided_slice %182 {offsets = [0, 24], sizes = [16, 8], strides = [1, 1]} : vector<16x128xf32> to vector<16x8xf32>
    %232 = vector.extract_strided_slice %182 {offsets = [0, 56], sizes = [16, 8], strides = [1, 1]} : vector<16x128xf32> to vector<16x8xf32>
    %233 = vector.extract_strided_slice %182 {offsets = [0, 88], sizes = [16, 8], strides = [1, 1]} : vector<16x128xf32> to vector<16x8xf32>
    %234 = arith.truncf %231 : vector<16x8xf32> to vector<16x8xbf16>
    %235 = arith.truncf %232 : vector<16x8xf32> to vector<16x8xbf16>
    %cst_72 = arith.constant dense<0.000000e+00> : vector<16x16xf32>
    %236 = tpu.matmul %234, %235, %cst_72 {dimension_numbers = #tpu.dot_dimension_numbers<[1], [1], [0], [0], [0, 0, 1, 0], [], []>} : vector<16x8xbf16>, vector<16x8xbf16>, vector<16x16xf32> -> vector<16x16xf32>
    %237 = arith.addf %236, %3 : vector<16x16xf32>
    %238 = math.exp %237 : vector<16x16xf32>
    %cst_73 = arith.constant dense<0.000000e+00> : vector<16xf32>
    %239 = vector.multi_reduction <add>, %238, %cst_73 [1] : vector<16x16xf32> to vector<16xf32>
    %240 = vector.shape_cast %239 : vector<16xf32> to vector<16x1xf32>
    %241 = tpu.reciprocal %240 {approx = true} : vector<16x1xf32> -> vector<16x1xf32>
    %242 = vector.broadcast %241 : vector<16x1xf32> to vector<16x16xf32>
    %243 = arith.mulf %238, %242 : vector<16x16xf32>
    %244 = arith.truncf %243 : vector<16x16xf32> to vector<16x16xbf16>
    %245 = arith.truncf %233 : vector<16x8xf32> to vector<16x8xbf16>
    %cst_74 = arith.constant dense<0.000000e+00> : vector<16x8xf32>
    %246 = tpu.matmul %244, %245, %cst_74 {dimension_numbers = #tpu.dot_dimension_numbers<[1], [0], [0], [1], [0, 0, 1, 1], [], []>} : vector<16x16xbf16>, vector<16x8xbf16>, vector<16x8xf32> -> vector<16x8xf32>
    %247 = tpu.concatenate %198, %214, %230, %246 in 1 : vector<16x8xf32>, vector<16x8xf32>, vector<16x8xf32>, vector<16x8xf32> -> vector<16x32xf32>
    %248 = arith.truncf %247 : vector<16x32xf32> to vector<16x32xbf16>
    %cst_75 = arith.constant dense<0.000000e+00> : vector<16x32xf32>
    %249 = tpu.matmul %248, %156, %cst_75 {dimension_numbers = #tpu.dot_dimension_numbers<[1], [0], [0], [1], [0, 0, 1, 1], [], []>} : vector<16x32xbf16>, vector<32x32xbf16>, vector<16x32xf32> -> vector<16x32xf32>
    %250 = arith.addf %146, %249 : vector<16x32xf32>
    %251 = vector.broadcast %150 : vector<1x32xf32> to vector<16x32xf32>
    %252 = arith.addf %250, %251 : vector<16x32xf32>
    %cst_76 = arith.constant dense<0.000000e+00> : vector<16xf32>
    %253 = vector.multi_reduction <add>, %252, %cst_76 [1] : vector<16x32xf32> to vector<16xf32>
    %254 = vector.shape_cast %253 : vector<16xf32> to vector<16x1xf32>
    %cst_77 = arith.constant 3.200000e+01 : f32
    %255 = vector.broadcast %cst_77 : f32 to vector<16x1xf32>
    %256 = arith.divf %254, %255 : vector<16x1xf32>
    %257 = vector.broadcast %256 : vector<16x1xf32> to vector<16x32xf32>
    %258 = arith.subf %252, %257 : vector<16x32xf32>
    %259 = arith.mulf %258, %258 : vector<16x32xf32>
    %cst_78 = arith.constant dense<0.000000e+00> : vector<16xf32>
    %260 = vector.multi_reduction <add>, %259, %cst_78 [1] : vector<16x32xf32> to vector<16xf32>
    %261 = vector.shape_cast %260 : vector<16xf32> to vector<16x1xf32>
    %cst_79 = arith.constant 3.200000e+01 : f32
    %262 = vector.broadcast %cst_79 : f32 to vector<16x1xf32>
    %263 = arith.divf %261, %262 : vector<16x1xf32>
    %cst_80 = arith.constant 9.99999974E-6 : f32
    %264 = vector.broadcast %cst_80 : f32 to vector<16x1xf32>
    %265 = arith.addf %263, %264 : vector<16x1xf32>
    %266 = math.rsqrt %265 : vector<16x1xf32>
    %267 = vector.broadcast %266 : vector<16x1xf32> to vector<16x32xf32>
    %268 = arith.mulf %258, %267 : vector<16x32xf32>
    %269 = vector.broadcast %151 : vector<1x32xf32> to vector<16x32xf32>
    %270 = arith.mulf %268, %269 : vector<16x32xf32>
    %271 = vector.broadcast %152 : vector<1x32xf32> to vector<16x32xf32>
    %272 = arith.addf %270, %271 : vector<16x32xf32>
    %273 = arith.truncf %272 : vector<16x32xf32> to vector<16x32xbf16>
    %cst_81 = arith.constant dense<0.000000e+00> : vector<16x128xf32>
    %274 = tpu.matmul %273, %157, %cst_81 {dimension_numbers = #tpu.dot_dimension_numbers<[1], [0], [0], [1], [0, 0, 1, 1], [], []>} : vector<16x32xbf16>, vector<32x128xbf16>, vector<16x128xf32> -> vector<16x128xf32>
    %275 = vector.broadcast %153 : vector<1x128xf32> to vector<16x128xf32>
    %276 = arith.addf %274, %275 : vector<16x128xf32>
    %cst_82 = arith.constant 1.702000e+00 : f32
    %277 = vector.broadcast %cst_82 : f32 to vector<16x128xf32>
    %278 = arith.mulf %277, %276 : vector<16x128xf32>
    %279 = arith.negf %278 : vector<16x128xf32>
    %280 = math.exp %279 : vector<16x128xf32>
    %cst_83 = arith.constant 1.000000e+00 : f32
    %281 = vector.broadcast %cst_83 : f32 to vector<16x128xf32>
    %282 = arith.addf %281, %280 : vector<16x128xf32>
    %283 = arith.divf %281, %282 : vector<16x128xf32>
    %284 = arith.mulf %276, %283 : vector<16x128xf32>
    %285 = arith.truncf %284 : vector<16x128xf32> to vector<16x128xbf16>
    %cst_84 = arith.constant dense<0.000000e+00> : vector<16x32xf32>
    %286 = tpu.matmul %285, %158, %cst_84 {dimension_numbers = #tpu.dot_dimension_numbers<[1], [0], [0], [1], [0, 0, 1, 1], [], []>} : vector<16x128xbf16>, vector<128x32xbf16>, vector<16x32xf32> -> vector<16x32xf32>
    %287 = arith.addf %252, %286 : vector<16x32xf32>
    %288 = vector.broadcast %154 : vector<1x32xf32> to vector<16x32xf32>
    %289 = arith.addf %287, %288 : vector<16x32xf32>
    %c0_85 = arith.constant 0 : index
    %c0_86 = arith.constant 0 : index
    %290 = vector.load %arg1[%c0_85, %c0_86] : memref<2x16xf32, #tpu.memory_space<vmem>>, vector<2x16xf32>
    %291 = arith.truncf %290 : vector<2x16xf32> to vector<2x16xbf16>
    %292 = arith.truncf %289 : vector<16x32xf32> to vector<16x32xbf16>
    %cst_87 = arith.constant dense<0.000000e+00> : vector<2x32xf32>
    %293 = tpu.matmul %291, %292, %cst_87 {dimension_numbers = #tpu.dot_dimension_numbers<[1], [0], [0], [1], [0, 0, 1, 1], [], []>} : vector<2x16xbf16>, vector<16x32xbf16>, vector<2x32xf32> -> vector<2x32xf32>
    %c48 = arith.constant 48 : index
    %c0_88 = arith.constant 0 : index
    %294 = vector.load %arg2[%c48, %c0_88] : memref<88x128xf32, #tpu.memory_space<vmem>>, vector<1x32xf32>
    %c49 = arith.constant 49 : index
    %c0_89 = arith.constant 0 : index
    %295 = vector.load %arg2[%c49, %c0_89] : memref<88x128xf32, #tpu.memory_space<vmem>>, vector<1x32xf32>
    %cst_90 = arith.constant dense<0.000000e+00> : vector<2xf32>
    %296 = vector.multi_reduction <add>, %293, %cst_90 [1] : vector<2x32xf32> to vector<2xf32>
    %297 = vector.shape_cast %296 : vector<2xf32> to vector<2x1xf32>
    %cst_91 = arith.constant 3.200000e+01 : f32
    %298 = vector.broadcast %cst_91 : f32 to vector<2x1xf32>
    %299 = arith.divf %297, %298 : vector<2x1xf32>
    %300 = vector.broadcast %299 : vector<2x1xf32> to vector<2x32xf32>
    %301 = arith.subf %293, %300 : vector<2x32xf32>
    %302 = arith.mulf %301, %301 : vector<2x32xf32>
    %cst_92 = arith.constant dense<0.000000e+00> : vector<2xf32>
    %303 = vector.multi_reduction <add>, %302, %cst_92 [1] : vector<2x32xf32> to vector<2xf32>
    %304 = vector.shape_cast %303 : vector<2xf32> to vector<2x1xf32>
    %cst_93 = arith.constant 3.200000e+01 : f32
    %305 = vector.broadcast %cst_93 : f32 to vector<2x1xf32>
    %306 = arith.divf %304, %305 : vector<2x1xf32>
    %cst_94 = arith.constant 9.99999974E-6 : f32
    %307 = vector.broadcast %cst_94 : f32 to vector<2x1xf32>
    %308 = arith.addf %306, %307 : vector<2x1xf32>
    %309 = math.rsqrt %308 : vector<2x1xf32>
    %310 = vector.broadcast %309 : vector<2x1xf32> to vector<2x32xf32>
    %311 = arith.mulf %301, %310 : vector<2x32xf32>
    %312 = vector.broadcast %294 : vector<1x32xf32> to vector<2x32xf32>
    %313 = arith.mulf %311, %312 : vector<2x32xf32>
    %314 = vector.broadcast %295 : vector<1x32xf32> to vector<2x32xf32>
    %315 = arith.addf %313, %314 : vector<2x32xf32>
    %c56 = arith.constant 56 : index
    %c0_95 = arith.constant 0 : index
    %316 = vector.load %arg2[%c56, %c0_95] : memref<88x128xf32, #tpu.memory_space<vmem>>, vector<32x32xf32>
    %317 = arith.truncf %315 : vector<2x32xf32> to vector<2x32xbf16>
    %318 = arith.truncf %316 : vector<32x32xf32> to vector<32x32xbf16>
    %cst_96 = arith.constant dense<0.000000e+00> : vector<2x32xf32>
    %319 = tpu.matmul %317, %318, %cst_96 {dimension_numbers = #tpu.dot_dimension_numbers<[1], [0], [0], [1], [0, 0, 1, 1], [], []>} : vector<2x32xbf16>, vector<32x32xbf16>, vector<2x32xf32> -> vector<2x32xf32>
    %c0_97 = arith.constant 0 : index
    %c0_98 = arith.constant 0 : index
    %320 = vector.load %arg4[%c0_97, %c0_98] : memref<2x32xf32, #tpu.memory_space<vmem>>, vector<2x32xf32>
    tpu.vector_store %arg4[%c0_97, %c0_98], %319 {strides = array<i32>} : memref<2x32xf32, #tpu.memory_space<vmem>>, vector<2x32xf32>,
    return
  }
}

</mosaic_0001>

<bundles_post_ra>
// kernel: text_encoder.1
= control target key start
LH: loop header
LB: loop body
LE: loop exit
PB: predicated region body
PF: predicated region fallthrough
CT: control target
= control target key end

     0   :  { %9 = vsyncpa [#allocation3], 0  ;;  %s2124_s0 = inlined_call_operand.hbm [shape: f32[16,32], index: 0, kind: input, shape index: {}]   ;;  %s2125_s1 = inlined_call_operand.vmem [shape: f32[2,16], index: 1, kind: input, shape index: {}]   ;;  %s2126_s2 = inlined_call_operand.hbm [shape: f32[88,128], index: 2, kind: input, shape index: {}]   ;;  %s2127_s3 = inlined_call_operand.hbm [shape: bf16[448,128], index: 3, kind: input, shape index: {}]   ;;  %s2128_s4 = inlined_call_operand.hbm [shape: f32[2,32], index: 4, kind: output, shape index: {}]  }
   0x1   :  { %10 = vsyncpa [#allocation6], 0 }
   0x2   :  { %11 = vsyncpa [#allocation4], 0  ;;  %s31_s17 = sshll.u32 %s2126_s2, 4  ;;  %s1832_s18 = smov [#allocation5]   ;;  %s32_s17 = int_to_ptr.hbm [resolvable:$true] %s31_s17 }
   0x3   :  { %s33_s19 = sshll.u32 %s1832_s18, 4  ;;  %s16_s22 = sshll.u32 %s2124_s0, 4  ;;  %s34_s19 = int_to_ptr.vmem [resolvable:$true] %s33_s19  ;;  %s17_s22 = int_to_ptr.hbm [resolvable:$true] %s16_s22 }
   0x4   :  { %s1833_s23 = smov 128   ;;  %s1834_s24 = smov 8  }
   0x5   :  { %39 = dma.hbm_to_vmem [thread:$0]  %s32_s17, 1408, %s34_s19, [#allocation6], %s1833_s23, %s1833_s23, %s1834_s24  }
   0x6   :  { %s1835_s25 = smov [#allocation2]   ;;  %s44_s29 = sshll.u32 %s2127_s3, 4  ;;  %s45_s29 = int_to_ptr.hbm [resolvable:$true] %s44_s29 }
   0x7   :  { %s18_s26 = sshll.u32 %s1835_s25, 4  ;;  %s1836_s2 = smov [#allocation7]   ;;  %s19_s26 = int_to_ptr.vmem [resolvable:$true] %s18_s26 }
   0x8   :  { %24 = dma.hbm_to_vmem [thread:$0]  %s17_s22, 256, %s19_s26, [#allocation3], %s1833_s23, %s1833_s23, %s1834_s24  }
   0x9   :  { %s46_s30 = sshll.u32 %s1836_s2, 4  ;;  %s1837_s5 = smov 64   ;;  %s47_s30 = int_to_ptr.vmem [resolvable:$true] %s46_s30 }
   0xa   :  { %s1838_s0 = smov 4  }
   0xb   :  { %52 = dma.hbm_to_vmem [thread:$0]  %s45_s29, 3584, %s47_s30, [#allocation6], %s1837_s5, %s1837_s5, %s1838_s0  }
   0xc   :  { %1826 = dma.done.wait [#allocation3], 256  }
   0xd   :  { %1827 = vsyncadd [#allocation3], 4294967040 }
   0xe   :  { %1828 = dma.done.wait [#allocation6], 4992  }
   0xf   :  { %1829 = vsyncadd [#allocation6], 4294962304  ;;  %v66_v0 = vld [vmem:[#allocation2] sm:$0xff]  ;;  %v68_v1 = vld [vmem:[#allocation5] sm:$0xff]  ;;  %vm110_vm0 = vcmask 261120   ;;  %v1839_v8 = vmov 32.0  }
  0x10   :  { %v67_v2 = vld [vmem:[#allocation2 + $0x8] sm:$0xff]  ;;  %v1891_v3 = vadd.f32 %v68_v1, %v66_v0  ;;  %v69_v4 = vld [vmem:[#allocation5 + $0x8] sm:$0xff]  ;;  %1630 = vrcp.f32 %v1839_v8  ;;  %v1534_v25 = vld [vmem:[#allocation7 + $0x8] sm:$0xff]  ;;  %s1840_s3 = smov 88   ;;  %s1841_s6 = smov 96   ;;  %vm203_vm8 = vcmask 64512  }
  0x11   :  { %v1895_v6 = vadd.f32 %v69_v4, %v67_v2  ;;  %191 = vmatpush.bf16.msra.mxu0 %v1534_v25  ;;  %v1533_v27 = vld [vmem:[#allocation7] sm:$0xff]  ;;  %v1612_v46 = vld [vmem:[#allocation5 + $0x20] ss:$0 sm:$0xff]  ;;  %v1613_v51 = vld [vmem:[#allocation5 + $0x21] ss:$0 sm:$0xff]  ;;  %s1842_s7 = smov 120  }
  0x12   :  { %v111_v5 = vsel %vm110_vm0, %v1891_v3, 0.0  ;;  %v1614_v57 = vld [vmem:[#allocation5 + $0x22] ss:$0 sm:$0xff]  ;;  %s1843_s8 = smov 104   ;;  %v1926_v4 = vld [vmem:[#allocation5 + $0x10] sm:$0xff]  ;;  %vm228_vm9 = vcmask 130048  }
  0x13   :  { %112 = vadd.xlane.f32.xlu0 %v111_v5  ;;  %v114_v7 = vsel %vm110_vm0, %v1895_v6, 0.0  ;;  %s1844_s9 = smov 80   ;;  %s1845_s10 = smov 72   ;;  %vm465_vm10 = vcmask 195584  }
  0x14   :  { %s1846_s11 = smov 56   ;;  %s1847_s12 = smov 112  }
  0x15   :  { %192 = vmatpush.bf16.msra.mxu0 %v1533_v27  ;;  %s1848_s13 = smov 40   ;;  %s1849_s14 = smov 48  }
  0x16   :  { %v1631_v9 = vpop.eup %1630  ;;  %s1850_s15 = smov 16   ;;  %s1851_s16 = smov 24  }
  0x17   :  { %v118_v10 = vmul.f32 32.0, %v1631_v9  ;;  %vm122_vm1 = vweird.f32 %v1631_v9  ;;  %s1382_s22 = sshll.u32 %s2128_s4, 4  ;;  %s1383_s22 = int_to_ptr.hbm [resolvable:$true] %s1382_s22 }
  0x19   :  { %v119_v11 = vsub.f32 1.0, %v118_v10 }
  0x1b   :  { %115 = vadd.xlane.f32.xlu0 %v114_v7  ;;  %v120_v12 = vmul.f32 %v1631_v9, %v119_v11 }
  0x1d   :  { %v121_v13 = vadd.f32 %v1631_v9, %v120_v12 }
  0x1f   :  { %v1899_v14 = vsel %vm122_vm1, %v1631_v9, %v121_v13  ;;  %v1929_v9 = vld [vmem:[#allocation5 + $0x18] sm:$0xff] }
  0x86   :  { %v113_v15 = vpop.xlane.xlu0 %112 }
  0x87   :  { %v124_v16 = vmul.f32 %v1899_v14, %v113_v15 }
  0x89   :  { %v126_v17 = vsub.f32 %v1891_v3, %v124_v16 }
  0x8b   :  { %v128_v18 = vmul.f32 %v126_v17, %v126_v17 }
  0x8d   :  { %v130_v19 = vsel %vm110_vm0, %v128_v18, 0.0 }
  0x8e   :  { %131 = vadd.xlane.f32.xlu1 %v130_v19  ;;  %v116_v20 = vpop.xlane.xlu0 %115 }
  0x8f   :  { %v125_v21 = vmul.f32 %v1899_v14, %v116_v20 }
  0x91   :  { %v127_v22 = vsub.f32 %v1895_v6, %v125_v21 }
  0x93   :  { %v129_v23 = vmul.f32 %v127_v22, %v127_v22 }
  0x95   :  { %v133_v24 = vsel %vm110_vm0, %v129_v23, 0.0 }
  0x96   :  { %134 = vadd.xlane.f32.xlu1 %v133_v24 }
 0x101   :  { %v132_v26 = vpop.xlane.xlu1 %131 }
 0x102   :  { %v136_v28 = vmul.f32 %v132_v26, %v1899_v14 }
 0x104   :  { %v138_v29 = vadd.f32 1e-05, %v136_v28 }
 0x106   :  { %1632 = vrsqrt.f32 %v138_v29  ;;  %vm146_vm3 = vweird.f32 %v138_v29 }
 0x109   :  { %v135_v30 = vpop.xlane.xlu1 %134 }
 0x10a   :  { %v137_v31 = vmul.f32 %v135_v30, %v1899_v14 }
 0x10c   :  { %v1633_v32 = vpop.eup %1632  ;;  %v139_v33 = vadd.f32 1e-05, %v137_v31 }
 0x10d   :  { %v141_v34 = vmul.f32 %v1633_v32, %v138_v29  ;;  %vm147_vm2 = vweird.f32 %v1633_v32 }
 0x10e   :  { %1634 = vrsqrt.f32 %v139_v33  ;;  %vm148_vm4 = vmor %vm146_vm3, %vm147_vm2  ;;  %vm156_vm6 = vweird.f32 %v139_v33 }
 0x10f   :  { %v142_v35 = vmul.f32 %v1633_v32, %v141_v34 }
 0x111   :  { %v143_v36 = vmul.f32 0.5, %v142_v35 }
 0x113   :  { %v144_v37 = vsub.f32 1.5, %v143_v36 }
 0x114   :  { %v1635_v38 = vpop.eup %1634 }
 0x115   :  { %v145_v39 = vmul.f32 %v1633_v32, %v144_v37  ;;  %v151_v40 = vmul.f32 %v1635_v38, %v139_v33  ;;  %vm157_vm5 = vweird.f32 %v1635_v38 }
 0x116   :  { %vm158_vm7 = vmor %vm156_vm6, %vm157_vm5 }
 0x117   :  { %v152_v41 = vmul.f32 %v1635_v38, %v151_v40  ;;  %v149_v42 = vsel %vm148_vm4, %v1633_v32, %v145_v39 }
 0x118   :  { %v160_v45 = vmul.f32 %v149_v42, %v126_v17 }
 0x119   :  { %v153_v43 = vmul.f32 0.5, %v152_v41 }
 0x11a   :  { %v163_v50 = vmul.f32 %v1612_v46, %v160_v45 }
 0x11b   :  { %v154_v44 = vsub.f32 1.5, %v153_v43 }
 0x11c   :  { %v166_v53 = vadd.f32 %v1613_v51, %v163_v50 }
 0x11d   :  { %v155_v47 = vmul.f32 %v1635_v38, %v154_v44 }
 0x11f   :  { %v159_v48 = vsel %vm158_vm7, %v1635_v38, %v155_v47 }
 0x120   :  { %v161_v49 = vmul.f32 %v159_v48, %v127_v22 }
 0x122   :  { %v164_v52 = vmul.f32 %v1612_v46, %v161_v49 }
 0x124   :  { %v167_v54 = vadd.f32 %v1613_v51, %v164_v52 }
 0x126   :  { %v168_v55 = vpack.c.bf16 %v167_v54, %v166_v53 }
 0x128   :  { %1401 = vmatmul.msk.bf16.vlgmr.msra.gmra.mxu0 %vm110_vm0, %v168_v55 }
 0x1a5   :  { %v194_v56 = vpop.f32.mrf.mxu0 }
 0x1a6   :  { %v195_v59 = vadd.f32 %v1614_v57, %v194_v56 }
 0x1ad   :  { %v196_v58 = vpop.f32.mrf.mxu0 }
 0x1ae   :  { %v197_v60 = vadd.f32 %v1614_v57, %v196_v58 }
 0x1b0   :  { %v1910_v61 = vpack.c.bf16 %v197_v60, %v195_v59 }
 0x1b2   :  { %262 = vrot.lane.b32.xlu0 %v1910_v61, %s1840_s3  ;;  %240 = vrot.lane.b32.xlu1 %v1910_v61, %s1837_s5 }
 0x1b3   :  { %201 = vrot.lane.b32.xlu2 %v1910_v61, %s1841_s6 }
 0x1ba   :  { %260 = vrot.lane.b32.xlu1 %v1910_v61, %s1842_s7 }
 0x1c2   :  { %378 = vrot.lane.b32.xlu1 %v1910_v61, %s1843_s8 }
 0x20d   :  { %v202_v62 = vpop.permute.xlu2 %201 }
 0x20e   :  { %v208_v63 = vsel %vm203_vm8, %v202_v62, 0 }
 0x20f   :  { %217 = vmatpush.bf16.xpose.msra.mxu1 %v208_v63 }
 0x216   :  { %1402 = vmatmul.msk.bf16.vlgmr.msra.gmra.mxu1 %vm203_vm8, %v1910_v61 }
 0x224   :  { %v263_v0 = vpop.permute.xlu0 %262  ;;  %v241_v1 = vpop.permute.xlu1 %240 }
 0x225   :  { %253 = vmatpush.bf16.msra.mxu3 %v241_v1  ;;  %v268_v2 = vsel %vm203_vm8, %v263_v0, 0 }
 0x229   :  { %277 = vmatpush.bf16.xpose.msrb.mxu3 %v268_v2 }
 0x22c   :  { %v261_v30 = vpop.permute.xlu1 %260 }
 0x234   :  { %v379_v32 = vpop.permute.xlu1 %378 }
 0x293   :  { %v219_v5 = vpop.f32.mrf.mxu1 }
 0x294   :  { %v220_v7 = vadd.f32 %v219_v5, %v1926_v4 }
 0x296   :  { %v224_v8 = vmul.f32 1.442695, %v220_v7 }
 0x298   :  { %1636 = vpow2.f32 %v224_v8 }
 0x29b   :  { %v221_v10 = vpop.f32.mrf.mxu1 }
 0x29c   :  { %v222_v11 = vadd.f32 %v221_v10, %v1929_v9 }
 0x29e   :  { %v1637_v12 = vpop.eup %1636  ;;  %v226_v13 = vmul.f32 1.442695, %v222_v11 }
 0x29f   :  { %v229_v15 = vsel %vm228_vm9, %v1637_v12, 0.0 }
 0x2a0   :  { %1638 = vpow2.f32 %v226_v13  ;;  %230 = vadd.xlane.f32.xlu2 %v229_v15 }
 0x2a6   :  { %v1639_v16 = vpop.eup %1638 }
 0x2a7   :  { %v232_v17 = vsel %vm228_vm9, %v1639_v16, 0.0 }
 0x2a8   :  { %233 = vadd.xlane.f32.xlu0 %v232_v17 }
 0x2b8   :  { %321 = vrot.lane.b32.xlu2 %v1910_v61, %s1844_s9 }
 0x2bc   :  { %380 = vrot.lane.b32.xlu0 %v1910_v61, %s1845_s10 }
 0x2c0   :  { %299 = vrot.lane.b32.xlu2 %v1910_v61, %s1846_s11 }
 0x2c4   :  { %319 = vrot.lane.b32.xlu0 %v1910_v61, %s1847_s12 }
 0x313   :  { %v231_v18 = vpop.xlane.xlu2 %230 }
 0x314   :  { %1640 = vrcp.f32 %v231_v18 }
 0x31a   :  { %v1641_v22 = vpop.eup %1640 }
 0x31b   :  { %v234_v19 = vpop.xlane.xlu0 %233  ;;  %v322_v20 = vpop.permute.xlu2 %321  ;;  %v237_v25 = vmul.f32 %v1641_v22, %v1637_v12 }
 0x31c   :  { %1642 = vrcp.f32 %v234_v19  ;;  %v327_v21 = vsel %vm203_vm8, %v322_v20, 0 }
 0x31d   :  { %336 = vmatpush.bf16.xpose.msrb.mxu0 %v327_v21 }
 0x322   :  { %v1643_v23 = vpop.eup %1642 }
 0x323   :  { %v300_v24 = vpop.permute.xlu2 %299  ;;  %v238_v26 = vmul.f32 %v1643_v23, %v1639_v16 }
 0x324   :  { %312 = vmatpush.bf16.msra.mxu2 %v300_v24 }
 0x325   :  { %v239_v27 = vpack.c.bf16 %v238_v26, %v237_v25 }
 0x327   :  { %1403 = vmatmul.msk.bf16.vlgmr.msra.gmra.mxu3 %vm228_vm9, %v239_v27 }
 0x32e   :  { %v381_v28 = vpop.permute.xlu0 %380 }
 0x32f   :  { %v386_v29 = vsel %vm203_vm8, %v381_v28, 0 }
 0x330   :  { %395 = vmatpush.bf16.xpose.msra.mxu3 %v386_v29 }
 0x336   :  { %v320_v31 = vpop.permute.xlu0 %319 }
 0x337   :  { %1404 = vmatmul.msk.bf16.vlgmr.msrb.gmra.mxu3 %vm203_vm8, %v261_v30  ;;  %1406 = vmatmul.msk.bf16.vlgmr.msrb.gmra.mxu0 %vm203_vm8, %v320_v31 }
 0x347   :  { %1408 = vmatmul.msk.bf16.vlgmr.msra.gmra.mxu3 %vm203_vm8, %v379_v32 }
 0x3aa   :  { %v1948_v33 = vpop.f32.mrf.mxu3 }
 0x3b2   :  { %v1950_v34 = vpop.f32.mrf.mxu3 }
 0x3b4   :  { %v338_v35 = vpop.f32.mrf.mxu0 }
 0x3b5   :  { %v339_v45 = vadd.f32 %v338_v35, %v1926_v4 }
 0x3b7   :  { %v343_v48 = vmul.f32 1.442695, %v339_v45 }
 0x3ba   :  { %v279_v36 = vpop.f32.mrf.mxu3 }
 0x3bb   :  { %v280_v37 = vadd.f32 %v279_v36, %v1926_v4 }
 0x3bc   :  { %v340_v38 = vpop.f32.mrf.mxu0 }
 0x3bd   :  { %v284_v39 = vmul.f32 1.442695, %v280_v37  ;;  %v341_v40 = vadd.f32 %v340_v38, %v1929_v9 }
 0x3bf   :  { %1644 = vpow2.f32 %v284_v39  ;;  %v345_v41 = vmul.f32 1.442695, %v341_v40  ;;  %v1536_v40 = vld [vmem:[#allocation7 + $0x18] sm:$0xff] }
 0x3c0   :  { %490 = vmatpush.bf16.msra.mxu0 %v1536_v40  ;;  %v1617_v40 = vld [vmem:[#allocation5 + $0x25] ss:$0 sm:$0xff] }
 0x3c1   :  { %1646 = vpow2.f32 %v345_v41  ;;  %v1535_v41 = vld [vmem:[#allocation7 + $0x10] sm:$0xff] }
 0x3c2   :  { %v281_v42 = vpop.f32.mrf.mxu3 }
 0x3c3   :  { %v282_v43 = vadd.f32 %v281_v42, %v1929_v9 }
 0x3c4   :  { %491 = vmatpush.bf16.msra.mxu0 %v1535_v41 }
 0x3c5   :  { %v1645_v44 = vpop.eup %1644  ;;  %v286_v46 = vmul.f32 1.442695, %v282_v43 }
 0x3c6   :  { %v288_v47 = vsel %vm228_vm9, %v1645_v44, 0.0 }
 0x3c7   :  { %1648 = vpow2.f32 %v286_v46  ;;  %289 = vadd.xlane.f32.xlu1 %v288_v47  ;;  %v1647_v50 = vpop.eup %1646 }
 0x3c8   :  { %1650 = vpow2.f32 %v343_v48  ;;  %v350_v55 = vsel %vm228_vm9, %v1647_v50, 0.0 }
 0x3ca   :  { %v397_v49 = vpop.f32.mrf.mxu3 }
 0x3cb   :  { %v398_v51 = vadd.f32 %v397_v49, %v1926_v4 }
 0x3cd   :  { %v1649_v52 = vpop.eup %1648  ;;  %v402_v53 = vmul.f32 1.442695, %v398_v51 }
 0x3ce   :  { %v291_v54 = vsel %vm228_vm9, %v1649_v52, 0.0  ;;  %v1651_v57 = vpop.eup %1650 }
 0x3cf   :  { %1652 = vpow2.f32 %v402_v53  ;;  %292 = vadd.xlane.f32.xlu0 %v291_v54  ;;  %351 = vadd.xlane.f32.xlu1 %v350_v55  ;;  %v347_v63 = vsel %vm228_vm9, %v1651_v57, 0.0 }
 0x3d2   :  { %v399_v56 = vpop.f32.mrf.mxu3 }
 0x3d3   :  { %v400_v58 = vadd.f32 %v399_v56, %v1929_v9 }
 0x3d5   :  { %v1653_v59 = vpop.eup %1652  ;;  %v404_v60 = vmul.f32 1.442695, %v400_v58  ;;  %v1615_v58 = vld [vmem:[#allocation5 + $0x23] ss:$0 sm:$0xff] }
 0x3d6   :  { %v406_v62 = vsel %vm228_vm9, %v1653_v59, 0.0 }
 0x3d7   :  { %1654 = vpow2.f32 %v404_v60  ;;  %407 = vadd.xlane.f32.xlu2 %v406_v62  ;;  %348 = vadd.xlane.f32.xlu0 %v347_v63 }
 0x3dd   :  { %v1655_v0 = vpop.eup %1654 }
 0x3de   :  { %v409_v1 = vsel %vm228_vm9, %v1655_v0, 0.0 }
 0x3df   :  { %410 = vadd.xlane.f32.xlu1 %v409_v1 }
 0x3eb   :  { %417 = vrot.lane.b32.xlu0 %v1910_v61, %s1848_s13 }
 0x3f8   :  { %358 = vrot.lane.b32.xlu1 %v1910_v61, %s1849_s14 }
 0x43a   :  { %v290_v2 = vpop.xlane.xlu1 %289 }
 0x43b   :  { %1656 = vrcp.f32 %v290_v2 }
 0x441   :  { %v1657_v7 = vpop.eup %1656 }
 0x442   :  { %v293_v5 = vpop.xlane.xlu0 %292  ;;  %v352_v10 = vpop.xlane.xlu1 %351  ;;  %v296_v11 = vmul.f32 %v1657_v7, %v1645_v44 }
 0x443   :  { %1658 = vrcp.f32 %v293_v5 }
 0x449   :  { %v1659_v8 = vpop.eup %1658 }
 0x44a   :  { %v297_v12 = vmul.f32 %v1659_v8, %v1649_v52  ;;  %v408_v15 = vpop.xlane.xlu2 %407  ;;  %v349_v17 = vpop.xlane.xlu0 %348 }
 0x44c   :  { %v298_v13 = vpack.c.bf16 %v297_v12, %v296_v11 }
 0x44e   :  { %1405 = vmatmul.msk.bf16.vlgmr.msra.gmra.mxu2 %vm228_vm9, %v298_v13 }
 0x452   :  { %v411_v16 = vpop.xlane.xlu1 %410 }
 0x453   :  { %1660 = vrcp.f32 %v411_v16 }
 0x454   :  { %1662 = vrcp.f32 %v408_v15  ;;  %v1538_v15 = vld [vmem:[#allocation7 + $0x28] sm:$0xff] }
 0x455   :  { %1664 = vrcp.f32 %v349_v17 }
 0x456   :  { %1666 = vrcp.f32 %v352_v10 }
 0x459   :  { %v1661_v18 = vpop.eup %1660 }
 0x45a   :  { %v1663_v19 = vpop.eup %1662  ;;  %v415_v61 = vmul.f32 %v1661_v18, %v1655_v0 }
 0x45b   :  { %v414_v20 = vmul.f32 %v1663_v19, %v1653_v59  ;;  %v1665_v23 = vpop.eup %1664  ;;  %v1537_v19 = vld [vmem:[#allocation7 + $0x20] sm:$0xff] }
 0x45c   :  { %v1667_v24 = vpop.eup %1666  ;;  %v355_v25 = vmul.f32 %v1665_v23, %v1651_v57 }
 0x45d   :  { %v418_v21 = vpop.permute.xlu0 %417  ;;  %v416_v22 = vpack.c.bf16 %v415_v61, %v414_v20  ;;  %v356_v26 = vmul.f32 %v1667_v24, %v1647_v50 }
 0x45e   :  { %430 = vmatpush.bf16.msrb.mxu2 %v418_v21 }
 0x45f   :  { %v357_v28 = vpack.c.bf16 %v356_v26, %v355_v25 }
 0x461   :  { %1409 = vmatmul.msk.bf16.vlgmr.msrb.gmra.mxu2 %vm228_vm9, %v416_v22 }
 0x46a   :  { %v359_v27 = vpop.permute.xlu1 %358 }
 0x46b   :  { %371 = vmatpush.bf16.msrb.mxu1 %v359_v27 }
 0x46e   :  { %1407 = vmatmul.msk.bf16.vlgmr.msrb.gmra.mxu1 %vm228_vm9, %v357_v28 }
 0x46f   :  { %576 = vmatpush.bf16.msra.mxu1 %v1538_v15 }
 0x473   :  { %577 = vmatpush.bf16.msra.mxu1 %v1537_v19 }
 0x4d1   :  { %v314_v29 = vpop.f32.mrf.mxu2 }
 0x4d9   :  { %v316_v30 = vpop.f32.mrf.mxu2 }
 0x4da   :  { %v1582_v31 = vpack.i.bf16 %v316_v30, %v314_v29 }
 0x4dc   :  { %1583 = vrot.lane.b32.xlu2 %v1582_v31, %s1834_s24 }
 0x4e4   :  { %v432_v35 = vpop.f32.mrf.mxu2 }
 0x4eb   :  { %v373_v32 = vpop.f32.mrf.mxu1 }
 0x4ec   :  { %v434_v38 = vpop.f32.mrf.mxu2 }
 0x4ed   :  { %v1592_v39 = vpack.i.bf16 %v434_v38, %v432_v35 }
 0x4f3   :  { %v375_v36 = vpop.f32.mrf.mxu1 }
 0x4f4   :  { %v1587_v37 = vpack.i.bf16 %v375_v36, %v373_v32  ;;  %v1616_v36 = vld [vmem:[#allocation5 + $0x24] ss:$0 sm:$0xff] }
 0x4f6   :  { %1588 = vrot.lane.b32.xlu0 %v1587_v37, %s1850_s15 }
 0x4fe   :  { %1593 = vrot.lane.b32.xlu0 %v1592_v39, %s1851_s16 }
 0x536   :  { %v1584_v43 = vpop.permute.xlu2 %1583 }
 0x537   :  { %v1586_v44 = vunpack.i.h.bf16 %v1584_v43  ;;  %v1585_v45 = vunpack.i.l.bf16 %v1584_v43 }
 0x539   :  { %v462_v49 = vsel %vm203_vm8, %v1950_v34, %v1586_v44  ;;  %v461_v50 = vsel %vm203_vm8, %v1948_v33, %v1585_v45 }
 0x568   :  { %v1589_v42 = vpop.permute.xlu0 %1588 }
 0x569   :  { %v1591_v46 = vunpack.i.h.bf16 %v1589_v42  ;;  %v1590_v47 = vunpack.i.l.bf16 %v1589_v42 }
 0x56b   :  { %v463_v53 = vsel %vm228_vm9, %v461_v50, %v1590_v47  ;;  %v464_v54 = vsel %vm228_vm9, %v462_v49, %v1591_v46  ;;  %v1546_v47 = vld [vmem:[#allocation7 + $0x68] sm:$0xff]  ;;  %v1544_v49 = vld [vmem:[#allocation7 + $0x58] sm:$0xff]  ;;  %v1543_v50 = vld [vmem:[#allocation7 + $0x50] sm:$0xff] }
 0x56c   :  { %675 = vmatpush.bf16.msrb.mxu3 %v1546_v47 }
 0x570   :  { %v1594_v48 = vpop.permute.xlu0 %1593 }
 0x571   :  { %v1596_v51 = vunpack.i.h.bf16 %v1594_v48  ;;  %v1595_v52 = vunpack.i.l.bf16 %v1594_v48  ;;  %v1545_v48 = vld [vmem:[#allocation7 + $0x60] sm:$0xff] }
 0x572   :  { %676 = vmatpush.bf16.msrb.mxu3 %v1545_v48 }
 0x573   :  { %v466_v55 = vsel %vm465_vm10, %v463_v53, %v1595_v52  ;;  %v467_v56 = vsel %vm465_vm10, %v464_v54, %v1596_v51  ;;  %v1618_v51 = vld [vmem:[#allocation5 + $0x26] ss:$0 sm:$0xff] }
 0x574   :  { %v468_v57 = vpack.c.bf16 %v467_v56, %v466_v55  ;;  %v1542_v52 = vld [vmem:[#allocation7 + $0x48] sm:$0xff]  ;;  %v1541_v55 = vld [vmem:[#allocation7 + $0x40] sm:$0xff] }
 0x576   :  { %1418 = vmatmul.msk.bf16.vlgmr.msra.gmra.mxu0 %vm110_vm0, %v468_v57  ;;  %677 = vmatpush.bf16.msrb.mxu3 %v1544_v49  ;;  %v1548_v49 = vld [vmem:[#allocation7 + $0x78] sm:$0xff] }
 0x577   :  { %803 = vmatpush.bf16.msra.mxu2 %v1548_v49 }
 0x57a   :  { %678 = vmatpush.bf16.msrb.mxu3 %v1543_v50 }
 0x57e   :  { %679 = vmatpush.bf16.msrb.mxu3 %v1542_v52 }
 0x582   :  { %680 = vmatpush.bf16.msrb.mxu3 %v1541_v55 }
 0x5f3   :  { %v493_v59 = vpop.f32.mrf.mxu0 }
 0x5f4   :  { %v498_v34 = vadd.f32 %v493_v59, %v1891_v3 }
 0x5f6   :  { %v1984_v60 = vadd.f32 %v1615_v58, %v498_v34 }
 0x5f8   :  { %v503_v33 = vsel %vm110_vm0, %v1984_v60, 0.0 }
 0x5f9   :  { %504 = vadd.xlane.f32.xlu1 %v503_v33  ;;  %v1539_v33 = vld [vmem:[#allocation7 + $0x30] sm:$0xff] }
 0x5fb   :  { %v495_v62 = vpop.f32.mrf.mxu0 }
 0x5fc   :  { %v499_v63 = vadd.f32 %v495_v62, %v1895_v6 }
 0x5fe   :  { %v1989_v0 = vadd.f32 %v1615_v58, %v499_v63  ;;  %v1540_v58 = vld [vmem:[#allocation7 + $0x38] sm:$0xff] }
 0x5ff   :  { %681 = vmatpush.bf16.msrb.mxu3 %v1540_v58 }
 0x600   :  { %v506_v1 = vsel %vm110_vm0, %v1989_v0, 0.0 }
 0x601   :  { %507 = vadd.xlane.f32.xlu0 %v506_v1 }
 0x603   :  { %682 = vmatpush.bf16.msrb.mxu3 %v1539_v33 }
 0x66c   :  { %v505_v2 = vpop.xlane.xlu1 %504 }
 0x66d   :  { %v509_v5 = vmul.f32 %v505_v2, %v1899_v14 }
 0x66f   :  { %v511_v3 = vsub.f32 %v1984_v60, %v509_v5 }
 0x671   :  { %v513_v7 = vmul.f32 %v511_v3, %v511_v3 }
 0x673   :  { %v515_v8 = vsel %vm110_vm0, %v513_v7, 0.0 }
 0x674   :  { %516 = vadd.xlane.f32.xlu2 %v515_v8  ;;  %v508_v10 = vpop.xlane.xlu0 %507 }
 0x675   :  { %v510_v11 = vmul.f32 %v508_v10, %v1899_v14 }
 0x677   :  { %v512_v6 = vsub.f32 %v1989_v0, %v510_v11 }
 0x679   :  { %v514_v12 = vmul.f32 %v512_v6, %v512_v6 }
 0x67b   :  { %v518_v13 = vsel %vm110_vm0, %v514_v12, 0.0 }
 0x67c   :  { %519 = vadd.xlane.f32.xlu1 %v518_v13 }
 0x6e7   :  { %v517_v16 = vpop.xlane.xlu2 %516 }
 0x6e8   :  { %v521_v17 = vmul.f32 %v517_v16, %v1899_v14 }
 0x6ea   :  { %v523_v18 = vadd.f32 1e-05, %v521_v17 }
 0x6ec   :  { %1668 = vrsqrt.f32 %v523_v18  ;;  %vm531_vm12 = vweird.f32 %v523_v18 }
 0x6ef   :  { %v520_v61 = vpop.xlane.xlu1 %519 }
 0x6f0   :  { %v522_v20 = vmul.f32 %v520_v61, %v1899_v14 }
 0x6f2   :  { %v1669_v21 = vpop.eup %1668  ;;  %v524_v22 = vadd.f32 1e-05, %v522_v20 }
 0x6f3   :  { %v526_v23 = vmul.f32 %v1669_v21, %v523_v18  ;;  %vm532_vm11 = vweird.f32 %v1669_v21 }
 0x6f4   :  { %1670 = vrsqrt.f32 %v524_v22  ;;  %vm533_vm13 = vmor %vm531_vm12, %vm532_vm11  ;;  %vm541_vm15 = vweird.f32 %v524_v22 }
 0x6f5   :  { %v527_v24 = vmul.f32 %v1669_v21, %v526_v23 }
 0x6f7   :  { %v528_v25 = vmul.f32 0.5, %v527_v24 }
 0x6f9   :  { %v529_v26 = vsub.f32 1.5, %v528_v25 }
 0x6fa   :  { %v1671_v27 = vpop.eup %1670 }
 0x6fb   :  { %v530_v28 = vmul.f32 %v1669_v21, %v529_v26  ;;  %v536_v29 = vmul.f32 %v1671_v27, %v524_v22  ;;  %vm542_vm14 = vweird.f32 %v1671_v27 }
 0x6fc   :  { %vm543_vm1 = vmor %vm541_vm15, %vm542_vm14 }
 0x6fd   :  { %v537_v30 = vmul.f32 %v1671_v27, %v536_v29  ;;  %v534_v31 = vsel %vm533_vm13, %v1669_v21, %v530_v28 }
 0x6fe   :  { %v545_v37 = vmul.f32 %v534_v31, %v511_v3 }
 0x6ff   :  { %v538_v32 = vmul.f32 0.5, %v537_v30  ;;  %v1619_v30 = vld [vmem:[#allocation5 + $0x27] ss:$0 sm:$0xff] }
 0x700   :  { %v548_v41 = vmul.f32 %v1616_v36, %v545_v37 }
 0x701   :  { %v539_v35 = vsub.f32 1.5, %v538_v32 }
 0x702   :  { %v551_v44 = vadd.f32 %v1617_v40, %v548_v41 }
 0x703   :  { %v540_v38 = vmul.f32 %v1671_v27, %v539_v35 }
 0x705   :  { %v544_v39 = vsel %vm543_vm1, %v1671_v27, %v540_v38 }
 0x706   :  { %v546_v42 = vmul.f32 %v544_v39, %v512_v6 }
 0x708   :  { %v549_v43 = vmul.f32 %v1616_v36, %v546_v42 }
 0x70a   :  { %v552_v45 = vadd.f32 %v1617_v40, %v549_v43 }
 0x70c   :  { %v553_v46 = vpack.c.bf16 %v552_v45, %v551_v44 }
 0x70e   :  { %1427 = vmatmul.msk.bf16.vlgmr.msra.gmra.mxu1 %vm110_vm0, %v553_v46 }
 0x78b   :  { %v579_v53 = vpop.f32.mrf.mxu1 }
 0x78c   :  { %v580_v54 = vadd.f32 %v1618_v51, %v579_v53  ;;  %v1547_v53 = vld [vmem:[#allocation7 + $0x70] sm:$0xff] }
 0x78d   :  { %804 = vmatpush.bf16.msra.mxu2 %v1547_v53 }
 0x78e   :  { %v1428_v56 = vmul.f32 -1.702, %v580_v54 }
 0x790   :  { %v588_v57 = vmul.f32 1.442695, %v1428_v56 }
 0x792   :  { %1672 = vpow2.f32 %v588_v57 }
 0x793   :  { %v581_v59 = vpop.f32.mrf.mxu1 }
 0x794   :  { %v582_v34 = vadd.f32 %v1618_v51, %v581_v59 }
 0x796   :  { %v1429_v62 = vmul.f32 -1.702, %v582_v34 }
 0x798   :  { %v1673_v63 = vpop.eup %1672  ;;  %v590_v1 = vmul.f32 1.442695, %v1429_v62 }
 0x799   :  { %v592_v2 = vadd.f32 1.0, %v1673_v63 }
 0x79a   :  { %1674 = vpow2.f32 %v590_v1 }
 0x79b   :  { %1676 = vrcp.f32 %v592_v2  ;;  %v605_v15 = vand.u32 2147483648, %v592_v2  ;;  %vm599_vm3 = vweird.f32 %v592_v2  ;;  %v603_v16 = vand.u32 2147483647, %v592_v2 }
 0x79d   :  { %v606_v21 = vor.u32 1.1754944e-38, %v605_v15  ;;  %vm604_vm6 = vcmp.eq.f32.partialorder %v603_v16, 8.507059e+37 }
 0x7a0   :  { %v1675_v5 = vpop.eup %1674 }
 0x7a1   :  { %v1677_v3 = vpop.eup %1676  ;;  %v593_v7 = vadd.f32 1.0, %v1675_v5 }
 0x7a2   :  { %v595_v8 = vmul.f32 %v1677_v3, %v592_v2  ;;  %vm600_vm2 = vweird.f32 %v1677_v3 }
 0x7a3   :  { %1678 = vrcp.f32 %v593_v7  ;;  %vm601_vm4 = vmor %vm599_vm3, %vm600_vm2  ;;  %v620_v18 = vand.u32 2147483648, %v593_v7  ;;  %v618_v20 = vand.u32 2147483647, %v593_v7  ;;  %vm614_vm7 = vweird.f32 %v593_v7 }
 0x7a4   :  { %v596_v10 = vsub.f32 1.0, %v595_v8  ;;  %v1620_v8 = vld [vmem:[#allocation5 + $0x28] ss:$0 sm:$0xff] }
 0x7a5   :  { %v621_v24 = vor.u32 1.1754944e-38, %v620_v18  ;;  %vm619_vm12 = vcmp.eq.f32.partialorder %v618_v20, 8.507059e+37  ;;  %v1622_v20 = vld [vmem:[#allocation5 + $0x2a] ss:$0 sm:$0xff] }
 0x7a6   :  { %v597_v11 = vmul.f32 %v1677_v3, %v596_v10 }
 0x7a8   :  { %v598_v12 = vadd.f32 %v1677_v3, %v597_v11 }
 0x7a9   :  { %v1679_v6 = vpop.eup %1678 }
 0x7aa   :  { %v610_v13 = vmul.f32 %v1679_v6, %v593_v7  ;;  %v602_v19 = vsel %vm601_vm4, %v1677_v3, %v598_v12  ;;  %vm615_vm5 = vweird.f32 %v1679_v6  ;;  %v1621_v12 = vld [vmem:[#allocation5 + $0x29] ss:$0 sm:$0xff] }
 0x7ab   :  { %v607_v23 = vsel %vm604_vm6, %v606_v21, %v602_v19  ;;  %vm616_vm11 = vmor %vm614_vm7, %vm615_vm5 }
 0x7ac   :  { %v611_v17 = vsub.f32 1.0, %v610_v13  ;;  %v624_v27 = vmul.f32 %v607_v23, %v580_v54 }
 0x7ae   :  { %v612_v61 = vmul.f32 %v1679_v6, %v611_v17 }
 0x7b0   :  { %v613_v22 = vadd.f32 %v1679_v6, %v612_v61 }
 0x7b2   :  { %v617_v25 = vsel %vm616_vm11, %v1679_v6, %v613_v22 }
 0x7b3   :  { %v622_v26 = vsel %vm619_vm12, %v621_v24, %v617_v25 }
 0x7b4   :  { %v625_v28 = vmul.f32 %v622_v26, %v582_v34 }
 0x7b6   :  { %v626_v29 = vpack.c.bf16 %v625_v28, %v624_v27 }
 0x7b8   :  { %683 = vmatmul.bf16.vlgmr.msrb.gmra.mxu3 %v626_v29 }
 0x83b   :  { %v684_v31 = vpop.f32.mrf.mxu3 }
 0x83c   :  { %v689_v32 = vadd.f32 %v684_v31, %v1984_v60 }
 0x83e   :  { %v2003_v35 = vadd.f32 %v1619_v30, %v689_v32 }
 0x840   :  { %v730_v36 = vsel %vm110_vm0, %v2003_v35, 0.0 }
 0x841   :  { %731 = vadd.xlane.f32.xlu2 %v730_v36 }
 0x843   :  { %v686_v37 = vpop.f32.mrf.mxu3 }
 0x844   :  { %v690_v38 = vadd.f32 %v686_v37, %v1989_v0 }
 0x846   :  { %v2008_v39 = vadd.f32 %v1619_v30, %v690_v38 }
 0x848   :  { %v733_v40 = vsel %vm110_vm0, %v2008_v39, 0.0 }
 0x849   :  { %734 = vadd.xlane.f32.xlu0 %v733_v40 }
 0x8b4   :  { %v732_v41 = vpop.xlane.xlu2 %731 }
 0x8b5   :  { %v736_v42 = vmul.f32 %v732_v41, %v1899_v14 }
 0x8b7   :  { %v738_v60 = vsub.f32 %v2003_v35, %v736_v42 }
 0x8b9   :  { %v740_v43 = vmul.f32 %v738_v60, %v738_v60 }
 0x8bb   :  { %v742_v44 = vsel %vm110_vm0, %v740_v43, 0.0 }
 0x8bc   :  { %743 = vadd.xlane.f32.xlu1 %v742_v44  ;;  %v735_v45 = vpop.xlane.xlu0 %734 }
 0x8bd   :  { %v737_v46 = vmul.f32 %v735_v45, %v1899_v14 }
 0x8bf   :  { %v739_v0 = vsub.f32 %v2008_v39, %v737_v46 }
 0x8c1   :  { %v741_v47 = vmul.f32 %v739_v0, %v739_v0 }
 0x8c3   :  { %v745_v48 = vsel %vm110_vm0, %v741_v47, 0.0 }
 0x8c4   :  { %746 = vadd.xlane.f32.xlu2 %v745_v48 }
 0x92f   :  { %v744_v50 = vpop.xlane.xlu1 %743 }
 0x930   :  { %v748_v51 = vmul.f32 %v744_v50, %v1899_v14 }
 0x932   :  { %v750_v52 = vadd.f32 1e-05, %v748_v51 }
 0x934   :  { %1680 = vrsqrt.f32 %v750_v52  ;;  %vm758_vm14 = vweird.f32 %v750_v52 }
 0x937   :  { %v747_v54 = vpop.xlane.xlu2 %746 }
 0x938   :  { %v749_v55 = vmul.f32 %v747_v54, %v1899_v14 }
 0x93a   :  { %v1681_v56 = vpop.eup %1680  ;;  %v751_v57 = vadd.f32 1e-05, %v749_v55 }
 0x93b   :  { %v753_v58 = vmul.f32 %v1681_v56, %v750_v52  ;;  %vm759_vm13 = vweird.f32 %v1681_v56 }
 0x93c   :  { %1682 = vrsqrt.f32 %v751_v57  ;;  %vm760_vm15 = vmor %vm758_vm14, %vm759_vm13  ;;  %vm768_vm2 = vweird.f32 %v751_v57 }
 0x93d   :  { %v754_v59 = vmul.f32 %v1681_v56, %v753_v58 }
 0x93f   :  { %v755_v34 = vmul.f32 0.5, %v754_v59 }
 0x941   :  { %v756_v33 = vsub.f32 1.5, %v755_v34 }
 0x942   :  { %v1683_v62 = vpop.eup %1682 }
 0x943   :  { %v757_v63 = vmul.f32 %v1681_v56, %v756_v33  ;;  %v763_v1 = vmul.f32 %v1683_v62, %v751_v57  ;;  %vm769_vm1 = vweird.f32 %v1683_v62 }
 0x944   :  { %vm770_vm3 = vmor %vm768_vm2, %vm769_vm1 }
 0x945   :  { %v764_v2 = vmul.f32 %v1683_v62, %v763_v1  ;;  %v761_v5 = vsel %vm760_vm15, %v1681_v56, %v757_v63 }
 0x946   :  { %v772_v10 = vmul.f32 %v761_v5, %v738_v60 }
 0x947   :  { %v765_v3 = vmul.f32 0.5, %v764_v2 }
 0x948   :  { %v775_v13 = vmul.f32 %v1620_v8, %v772_v10 }
 0x949   :  { %v766_v7 = vsub.f32 1.5, %v765_v3 }
 0x94a   :  { %v778_v17 = vadd.f32 %v1621_v12, %v775_v13 }
 0x94b   :  { %v767_v11 = vmul.f32 %v1683_v62, %v766_v7 }
 0x94d   :  { %v771_v6 = vsel %vm770_vm3, %v1683_v62, %v767_v11 }
 0x94e   :  { %v773_v15 = vmul.f32 %v771_v6, %v739_v0 }
 0x950   :  { %v776_v16 = vmul.f32 %v1620_v8, %v773_v15 }
 0x952   :  { %v779_v18 = vadd.f32 %v1621_v12, %v776_v16 }
 0x954   :  { %v780_v19 = vpack.c.bf16 %v779_v18, %v778_v17 }
 0x956   :  { %1470 = vmatmul.msk.bf16.vlgmr.msra.gmra.mxu2 %vm110_vm0, %v780_v19 }
 0x9d9   :  { %v806_v61 = vpop.f32.mrf.mxu2 }
 0x9da   :  { %v807_v22 = vadd.f32 %v1622_v20, %v806_v61 }
 0x9e1   :  { %v808_v21 = vpop.f32.mrf.mxu2 }
 0x9e2   :  { %v809_v23 = vadd.f32 %v1622_v20, %v808_v21 }
 0x9e4   :  { %v2021_v24 = vpack.c.bf16 %v809_v23, %v807_v22 }
 0x9e6   :  { %850 = vrot.lane.b32.xlu2 %v2021_v24, %s1837_s5  ;;  %872 = vrot.lane.b32.xlu1 %v2021_v24, %s1840_s3 }
 0x9e7   :  { %813 = vrot.lane.b32.xlu0 %v2021_v24, %s1841_s6 }
 0x9ef   :  { %870 = vrot.lane.b32.xlu0 %v2021_v24, %s1842_s7 }
 0x9f7   :  { %931 = vrot.lane.b32.xlu0 %v2021_v24, %s1844_s9 }
 0x9ff   :  { %929 = vrot.lane.b32.xlu0 %v2021_v24, %s1847_s12 }
 0xa40   :  { %v851_v25 = vpop.permute.xlu2 %850 }
 0xa41   :  { %863 = vmatpush.bf16.msrb.mxu1 %v851_v25 }
 0xa58   :  { %v873_v26 = vpop.permute.xlu1 %872 }
 0xa59   :  { %v878_v27 = vsel %vm203_vm8, %v873_v26, 0  ;;  %v814_v28 = vpop.permute.xlu0 %813 }
 0xa5a   :  { %v819_v29 = vsel %vm203_vm8, %v814_v28, 0  ;;  %887 = vmatpush.bf16.xpose.msrb.mxu2 %v878_v27 }
 0xa5b   :  { %828 = vmatpush.bf16.xpose.msrb.mxu0 %v819_v29 }
 0xa61   :  { %v871_v30 = vpop.permute.xlu0 %870 }
 0xa62   :  { %1471 = vmatmul.msk.bf16.vlgmr.msrb.gmra.mxu0 %vm203_vm8, %v2021_v24  ;;  %1473 = vmatmul.msk.bf16.vlgmr.msrb.gmra.mxu2 %vm203_vm8, %v871_v30 }
 0xa69   :  { %v932_v31 = vpop.permute.xlu0 %931 }
 0xa6a   :  { %v937_v32 = vsel %vm203_vm8, %v932_v31, 0 }
 0xa6b   :  { %946 = vmatpush.bf16.xpose.msra.mxu1 %v937_v32 }
 0xa71   :  { %v930_v5 = vpop.permute.xlu0 %929 }
 0xadf   :  { %v830_v36 = vpop.f32.mrf.mxu0 }
 0xae0   :  { %v831_v37 = vadd.f32 %v830_v36, %v1926_v4 }
 0xae2   :  { %v835_v38 = vmul.f32 1.442695, %v831_v37 }
 0xae4   :  { %1684 = vpow2.f32 %v835_v38 }
 0xae5   :  { %v889_v40 = vpop.f32.mrf.mxu2 }
 0xae6   :  { %v890_v51 = vadd.f32 %v889_v40, %v1926_v4 }
 0xae7   :  { %v832_v41 = vpop.f32.mrf.mxu0 }
 0xae8   :  { %v833_v42 = vadd.f32 %v832_v41, %v1929_v9  ;;  %v894_v52 = vmul.f32 1.442695, %v890_v51 }
 0xaea   :  { %v1685_v60 = vpop.eup %1684  ;;  %v837_v43 = vmul.f32 1.442695, %v833_v42 }
 0xaeb   :  { %v839_v44 = vsel %vm228_vm9, %v1685_v60, 0.0 }
 0xaec   :  { %1686 = vpow2.f32 %v837_v43  ;;  %840 = vadd.xlane.f32.xlu1 %v839_v44 }
 0xaed   :  { %v891_v45 = vpop.f32.mrf.mxu2 }
 0xaee   :  { %v892_v46 = vadd.f32 %v891_v45, %v1929_v9 }
 0xaf0   :  { %v896_v0 = vmul.f32 1.442695, %v892_v46 }
 0xaf2   :  { %v1687_v47 = vpop.eup %1686  ;;  %1688 = vpow2.f32 %v896_v0 }
 0xaf3   :  { %v842_v48 = vsel %vm228_vm9, %v1687_v47, 0.0  ;;  %1690 = vpow2.f32 %v894_v52 }
 0xaf4   :  { %843 = vadd.xlane.f32.xlu2 %v842_v48 }
 0xaf8   :  { %v1689_v49 = vpop.eup %1688 }
 0xaf9   :  { %v901_v50 = vsel %vm228_vm9, %v1689_v49, 0.0  ;;  %v1691_v53 = vpop.eup %1690 }
 0xafa   :  { %902 = vadd.xlane.f32.xlu0 %v901_v50  ;;  %v898_v54 = vsel %vm228_vm9, %v1691_v53, 0.0 }
 0xb05   :  { %990 = vrot.lane.b32.xlu1 %v2021_v24, %s1845_s10 }
 0xb0c   :  { %988 = vrot.lane.b32.xlu2 %v2021_v24, %s1843_s8 }
 0xb14   :  { %909 = vrot.lane.b32.xlu2 %v2021_v24, %s1846_s11 }
 0xb2f   :  { %899 = vadd.xlane.f32.xlu1 %v898_v54 }
 0xb5f   :  { %v841_v55 = vpop.xlane.xlu1 %840 }
 0xb60   :  { %1692 = vrcp.f32 %v841_v55 }
 0xb66   :  { %v1693_v57 = vpop.eup %1692 }
 0xb67   :  { %v844_v56 = vpop.xlane.xlu2 %843  ;;  %v847_v59 = vmul.f32 %v1693_v57, %v1685_v60 }
 0xb68   :  { %1694 = vrcp.f32 %v844_v56 }
 0xb6d   :  { %v903_v3 = vpop.xlane.xlu0 %902 }
 0xb6e   :  { %v1695_v58 = vpop.eup %1694  ;;  %1696 = vrcp.f32 %v903_v3 }
 0xb6f   :  { %v848_v34 = vmul.f32 %v1695_v58, %v1687_v47  ;;  %v989_v33 = vpop.permute.xlu2 %988 }
 0xb71   :  { %v849_v62 = vpack.c.bf16 %v848_v34, %v847_v59  ;;  %v1550_v34 = vld [vmem:[#allocation7 + $0x88] sm:$0xff] }
 0xb73   :  { %1472 = vmatmul.msk.bf16.vlgmr.msrb.gmra.mxu1 %vm228_vm9, %v849_v62 }
 0xb74   :  { %v1697_v8 = vpop.eup %1696  ;;  %1099 = vmatpush.bf16.msrb.mxu1 %v1550_v34 }
 0xb75   :  { %v907_v11 = vmul.f32 %v1697_v8, %v1689_v49 }
 0xb77   :  { %v910_v63 = vpop.permute.xlu2 %909  ;;  %v991_v1 = vpop.permute.xlu1 %990 }
 0xb78   :  { %v996_v2 = vsel %vm203_vm8, %v991_v1, 0  ;;  %922 = vmatpush.bf16.msra.mxu0 %v910_v63 }
 0xb79   :  { %1005 = vmatpush.bf16.xpose.msra.mxu2 %v996_v2 }
 0xb80   :  { %1477 = vmatmul.msk.bf16.vlgmr.msra.gmra.mxu2 %vm203_vm8, %v989_v33  ;;  %v1549_v33 = vld [vmem:[#allocation7 + $0x80] sm:$0xff] }
 0xb81   :  { %1100 = vmatpush.bf16.msrb.mxu1 %v1549_v33 }
 0xb83   :  { %1475 = vmatmul.msk.bf16.vlgmr.msra.gmra.mxu1 %vm203_vm8, %v930_v5 }
 0xba2   :  { %v900_v7 = vpop.xlane.xlu1 %899 }
 0xba3   :  { %1698 = vrcp.f32 %v900_v7 }
 0xba9   :  { %v1699_v10 = vpop.eup %1698 }
 0xbaa   :  { %v906_v6 = vmul.f32 %v1699_v10, %v1691_v53 }
 0xbac   :  { %v908_v12 = vpack.c.bf16 %v907_v11, %v906_v6 }
 0xbae   :  { %1474 = vmatmul.msk.bf16.vlgmr.msra.gmra.mxu0 %vm228_vm9, %v908_v12 }
 0xbf0   :  { %v2060_v13 = vpop.f32.mrf.mxu1 }
 0xbf8   :  { %v2062_v15 = vpop.f32.mrf.mxu1 }
 0xc00   :  { %v948_v16 = vpop.f32.mrf.mxu1 }
 0xc01   :  { %v949_v17 = vadd.f32 %v948_v16, %v1926_v4 }
 0xc03   :  { %v953_v18 = vmul.f32 1.442695, %v949_v17  ;;  %v1007_v19 = vpop.f32.mrf.mxu2 }
 0xc04   :  { %v1008_v61 = vadd.f32 %v1007_v19, %v1926_v4 }
 0xc05   :  { %1700 = vpow2.f32 %v953_v18 }
 0xc06   :  { %v1012_v20 = vmul.f32 1.442695, %v1008_v61  ;;  %v1623_v61 = vld [vmem:[#allocation5 + $0x2b] ss:$0 sm:$0xff] }
 0xc08   :  { %1702 = vpow2.f32 %v1012_v20  ;;  %v950_v21 = vpop.f32.mrf.mxu1 }
 0xc09   :  { %v951_v22 = vadd.f32 %v950_v21, %v1929_v9 }
 0xc0b   :  { %v1701_v23 = vpop.eup %1700  ;;  %v955_v25 = vmul.f32 1.442695, %v951_v22  ;;  %v1009_v26 = vpop.f32.mrf.mxu2 }
 0xc0c   :  { %v1010_v27 = vadd.f32 %v1009_v26, %v1929_v9  ;;  %v957_v28 = vsel %vm228_vm9, %v1701_v23, 0.0 }
 0xc0d   :  { %1704 = vpow2.f32 %v955_v25  ;;  %958 = vadd.xlane.f32.xlu2 %v957_v28 }
 0xc0e   :  { %v1703_v29 = vpop.eup %1702  ;;  %v1014_v30 = vmul.f32 1.442695, %v1010_v27 }
 0xc0f   :  { %v1016_v31 = vsel %vm228_vm9, %v1703_v29, 0.0 }
 0xc10   :  { %1017 = vadd.xlane.f32.xlu0 %v1016_v31  ;;  %1706 = vpow2.f32 %v1014_v30 }
 0xc13   :  { %v1705_v4 = vpop.eup %1704 }
 0xc14   :  { %v960_v32 = vsel %vm228_vm9, %v1705_v4, 0.0 }
 0xc15   :  { %961 = vadd.xlane.f32.xlu1 %v960_v32 }
 0xc16   :  { %v1707_v36 = vpop.eup %1706 }
 0xc17   :  { %v1019_v37 = vsel %vm228_vm9, %v1707_v36, 0.0 }
 0xc1d   :  { %1020 = vadd.xlane.f32.xlu1 %v1019_v37  ;;  %v1552_v37 = vld [vmem:[#allocation7 + $0x98] sm:$0xff] }
 0xc24   :  { %968 = vrot.lane.b32.xlu0 %v2021_v24, %s1849_s14 }
 0xc25   :  { %1027 = vrot.lane.b32.xlu2 %v2021_v24, %s1848_s13 }
 0xc2b   :  { %v924_v9 = vpop.f32.mrf.mxu0 }
 0xc33   :  { %v926_v38 = vpop.f32.mrf.mxu0 }
 0xc34   :  { %v1597_v40 = vpack.i.bf16 %v926_v38, %v924_v9 }
 0xc36   :  { %1598 = vrot.lane.b32.xlu1 %v1597_v40, %s1834_s24  ;;  %v1551_v40 = vld [vmem:[#allocation7 + $0x90] sm:$0xff] }
 0xc80   :  { %v959_v41 = vpop.xlane.xlu2 %958 }
 0xc83   :  { %v1018_v43 = vpop.xlane.xlu0 %1017 }
 0xc88   :  { %v962_v42 = vpop.xlane.xlu1 %961  ;;  %v1028_v60 = vpop.permute.xlu2 %1027 }
 0xc89   :  { %1040 = vmatpush.bf16.msrb.mxu0 %v1028_v60  ;;  %1708 = vrcp.f32 %v962_v42 }
 0xc8a   :  { %1710 = vrcp.f32 %v959_v41 }
 0xc8b   :  { %1712 = vrcp.f32 %v1018_v43 }
 0xc8f   :  { %v1709_v45 = vpop.eup %1708 }
 0xc90   :  { %v1021_v44 = vpop.xlane.xlu1 %1020  ;;  %v1711_v46 = vpop.eup %1710  ;;  %v966_v0 = vmul.f32 %v1709_v45, %v1705_v4 }
 0xc91   :  { %1714 = vrcp.f32 %v1021_v44  ;;  %v1713_v47 = vpop.eup %1712  ;;  %v965_v24 = vmul.f32 %v1711_v46, %v1701_v23 }
 0xc92   :  { %v1024_v50 = vmul.f32 %v1713_v47, %v1703_v29 }
 0xc93   :  { %v967_v51 = vpack.c.bf16 %v966_v0, %v965_v24 }
 0xc96   :  { %v969_v48 = vpop.permute.xlu0 %968 }
 0xc97   :  { %v1715_v49 = vpop.eup %1714  ;;  %981 = vmatpush.bf16.msra.mxu3 %v969_v48 }
 0xc98   :  { %v1025_v52 = vmul.f32 %v1715_v49, %v1707_v36 }
 0xc9a   :  { %v1026_v53 = vpack.c.bf16 %v1025_v52, %v1024_v50  ;;  %1476 = vmatmul.msk.bf16.vlgmr.msra.gmra.mxu3 %vm228_vm9, %v967_v51 }
 0xc9b   :  { %1185 = vmatpush.bf16.msrb.mxu3 %v1552_v37 }
 0xc9c   :  { %1478 = vmatmul.msk.bf16.vlgmr.msrb.gmra.mxu0 %vm228_vm9, %v1026_v53 }
 0xc9f   :  { %1186 = vmatpush.bf16.msrb.mxu3 %v1551_v40 }
 0xca8   :  { %v1599_v62 = vpop.permute.xlu1 %1598 }
 0xca9   :  { %v1601_v63 = vunpack.i.h.bf16 %v1599_v62  ;;  %v1600_v1 = vunpack.i.l.bf16 %v1599_v62 }
 0xcab   :  { %v1072_v8 = vsel %vm203_vm8, %v2062_v15, %v1601_v63  ;;  %v1071_v10 = vsel %vm203_vm8, %v2060_v13, %v1600_v1 }
 0xd19   :  { %v1042_v54 = vpop.f32.mrf.mxu0 }
 0xd1d   :  { %v983_v55 = vpop.f32.mrf.mxu3 }
 0xd21   :  { %v1044_v56 = vpop.f32.mrf.mxu0 }
 0xd22   :  { %v1607_v57 = vpack.i.bf16 %v1044_v56, %v1042_v54  ;;  %v1624_v54 = vld [vmem:[#allocation5 + $0x2c] ss:$0 sm:$0xff] }
 0xd24   :  { %1608 = vrot.lane.b32.xlu2 %v1607_v57, %s1851_s16 }
 0xd25   :  { %v985_v58 = vpop.f32.mrf.mxu3 }
 0xd26   :  { %v1602_v59 = vpack.i.bf16 %v985_v58, %v983_v55  ;;  %v1625_v58 = vld [vmem:[#allocation5 + $0x2d] ss:$0 sm:$0xff] }
 0xd28   :  { %1603 = vrot.lane.b32.xlu0 %v1602_v59, %s1850_s15 }
 0xd7e   :  { %v1609_v2 = vpop.permute.xlu2 %1608 }
 0xd7f   :  { %v1611_v11 = vunpack.i.h.bf16 %v1609_v2  ;;  %v1610_v6 = vunpack.i.l.bf16 %v1609_v2  ;;  %v1560_v2 = vld [vmem:[#allocation7 + $0xd8] sm:$0xff] }
 0xd80   :  { %1284 = vmatpush.bf16.msrb.mxu2 %v1560_v2  ;;  %v1354_v2 = vld [vmem:[#allocation5 + $0x50] sm:$0xff] }
 0xd9a   :  { %v1604_v5 = vpop.permute.xlu0 %1603 }
 0xd9b   :  { %v1606_v3 = vunpack.i.h.bf16 %v1604_v5  ;;  %v1605_v7 = vunpack.i.l.bf16 %v1604_v5  ;;  %v1559_v5 = vld [vmem:[#allocation7 + $0xd0] sm:$0xff] }
 0xd9c   :  { %1285 = vmatpush.bf16.msrb.mxu2 %v1559_v5 }
 0xd9d   :  { %v1074_v12 = vsel %vm228_vm9, %v1072_v8, %v1606_v3  ;;  %v1073_v16 = vsel %vm228_vm9, %v1071_v10, %v1605_v7  ;;  %v1558_v3 = vld [vmem:[#allocation7 + $0xc8] sm:$0xff]  ;;  %v1557_v7 = vld [vmem:[#allocation7 + $0xc0] sm:$0xff]  ;;  %v1556_v8 = vld [vmem:[#allocation7 + $0xb8] sm:$0xff] }
 0xd9e   :  { %v1076_v17 = vsel %vm465_vm10, %v1074_v12, %v1611_v11  ;;  %v1075_v18 = vsel %vm465_vm10, %v1073_v16, %v1610_v6  ;;  %v1626_v10 = vld [vmem:[#allocation5 + $0x2e] ss:$0 sm:$0xff] }
 0xd9f   :  { %v1077_v19 = vpack.c.bf16 %v1076_v17, %v1075_v18  ;;  %v1555_v6 = vld [vmem:[#allocation7 + $0xb0] sm:$0xff]  ;;  %v1554_v17 = vld [vmem:[#allocation7 + $0xa8] sm:$0xff] }
 0xda0   :  { %1286 = vmatpush.bf16.msrb.mxu2 %v1558_v3  ;;  %v1351_v3 = vld [vmem:[#allocation5 + $0x38] sm:$0xff] }
 0xda1   :  { %1487 = vmatmul.msk.bf16.vlgmr.msrb.gmra.mxu1 %vm110_vm0, %v1077_v19 }
 0xda4   :  { %1287 = vmatpush.bf16.msrb.mxu2 %v1557_v7  ;;  %v1352_v7 = vld [vmem:[#allocation5 + $0x40] sm:$0xff] }
 0xda8   :  { %1288 = vmatpush.bf16.msrb.mxu2 %v1556_v8  ;;  %v1356_v8 = vpack.c.bf16 %v1352_v7, %v1351_v3 }
 0xdac   :  { %1289 = vmatpush.bf16.msrb.mxu2 %v1555_v6 }
 0xdb0   :  { %1290 = vmatpush.bf16.msrb.mxu2 %v1554_v17 }
 0xe1e   :  { %v1102_v20 = vpop.f32.mrf.mxu1 }
 0xe1f   :  { %v1107_v15 = vadd.f32 %v1102_v20, %v2003_v35 }
 0xe21   :  { %v2091_v21 = vadd.f32 %v1623_v61, %v1107_v15 }
 0xe23   :  { %v1112_v13 = vsel %vm110_vm0, %v2091_v21, 0.0 }
 0xe24   :  { %1113 = vadd.xlane.f32.xlu0 %v1112_v13 }
 0xe26   :  { %v1104_v22 = vpop.f32.mrf.mxu1 }
 0xe27   :  { %v1108_v23 = vadd.f32 %v1104_v22, %v2008_v39 }
 0xe29   :  { %v2096_v25 = vadd.f32 %v1623_v61, %v1108_v23  ;;  %v1553_v61 = vld [vmem:[#allocation7 + $0xa0] sm:$0xff] }
 0xe2a   :  { %1291 = vmatpush.bf16.msrb.mxu2 %v1553_v61 }
 0xe2b   :  { %v1115_v26 = vsel %vm110_vm0, %v2096_v25, 0.0 }
 0xe2c   :  { %1116 = vadd.xlane.f32.xlu1 %v1115_v26 }
 0xe97   :  { %v1114_v27 = vpop.xlane.xlu0 %1113 }
 0xe98   :  { %v1118_v28 = vmul.f32 %v1114_v27, %v1899_v14 }
 0xe9a   :  { %v1120_v35 = vsub.f32 %v2091_v21, %v1118_v28 }
 0xe9c   :  { %v1122_v29 = vmul.f32 %v1120_v35, %v1120_v35 }
 0xe9e   :  { %v1124_v30 = vsel %vm110_vm0, %v1122_v29, 0.0 }
 0xe9f   :  { %1125 = vadd.xlane.f32.xlu2 %v1124_v30  ;;  %v1117_v31 = vpop.xlane.xlu1 %1116 }
 0xea0   :  { %v1119_v4 = vmul.f32 %v1117_v31, %v1899_v14 }
 0xea2   :  { %v1121_v39 = vsub.f32 %v2096_v25, %v1119_v4 }
 0xea4   :  { %v1123_v32 = vmul.f32 %v1121_v39, %v1121_v39 }
 0xea6   :  { %v1127_v36 = vsel %vm110_vm0, %v1123_v32, 0.0 }
 0xea7   :  { %1128 = vadd.xlane.f32.xlu0 %v1127_v36 }
 0xf12   :  { %v1126_v9 = vpop.xlane.xlu2 %1125 }
 0xf13   :  { %v1130_v38 = vmul.f32 %v1126_v9, %v1899_v14 }
 0xf15   :  { %v1132_v41 = vadd.f32 1e-05, %v1130_v38 }
 0xf17   :  { %1716 = vrsqrt.f32 %v1132_v41  ;;  %vm1140_vm10 = vweird.f32 %v1132_v41 }
 0xf1a   :  { %v1129_v42 = vpop.xlane.xlu0 %1128 }
 0xf1b   :  { %v1131_v60 = vmul.f32 %v1129_v42, %v1899_v14 }
 0xf1d   :  { %v1717_v43 = vpop.eup %1716  ;;  %v1133_v44 = vadd.f32 1e-05, %v1131_v60 }
 0xf1e   :  { %v1135_v45 = vmul.f32 %v1717_v43, %v1132_v41  ;;  %vm1141_vm8 = vweird.f32 %v1717_v43 }
 0xf1f   :  { %1718 = vrsqrt.f32 %v1133_v44  ;;  %vm1142_vm4 = vmor %vm1140_vm10, %vm1141_vm8  ;;  %vm1150_vm6 = vweird.f32 %v1133_v44  ;;  %vm1324_vm8 = vcmask 254976  }
 0xf20   :  { %v1136_v46 = vmul.f32 %v1717_v43, %v1135_v45 }
 0xf22   :  { %v1137_v0 = vmul.f32 0.5, %v1136_v46 }
 0xf24   :  { %v1138_v47 = vsub.f32 1.5, %v1137_v0 }
 0xf25   :  { %v1719_v24 = vpop.eup %1718 }
 0xf26   :  { %v1139_v48 = vmul.f32 %v1717_v43, %v1138_v47  ;;  %v1145_v49 = vmul.f32 %v1719_v24, %v1133_v44  ;;  %vm1151_vm5 = vweird.f32 %v1719_v24 }
 0xf27   :  { %vm1152_vm7 = vmor %vm1150_vm6, %vm1151_vm5 }
 0xf28   :  { %v1146_v50 = vmul.f32 %v1719_v24, %v1145_v49  ;;  %v1143_v51 = vsel %vm1142_vm4, %v1717_v43, %v1139_v48 }
 0xf29   :  { %v1154_v55 = vmul.f32 %v1143_v51, %v1120_v35 }
 0xf2a   :  { %v1147_v52 = vmul.f32 0.5, %v1146_v50  ;;  %v1627_v50 = vld [vmem:[#allocation5 + $0x2f] ss:$0 sm:$0xff] }
 0xf2b   :  { %v1157_v59 = vmul.f32 %v1624_v54, %v1154_v55  ;;  %v1303_v55 = vld [vmem:[%s2125_s1] sm:$0x3]  ;;  %s1852_s1 = smov [#allocation8]  }
 0xf2c   :  { %v1148_v53 = vsub.f32 1.5, %v1147_v52  ;;  %s1380_s19 = sshll.u32 %s1852_s1, 4  ;;  %s1381_s19 = int_to_ptr.vmem [resolvable:$true] %s1380_s19 }
 0xf2d   :  { %v1160_v62 = vadd.f32 %v1625_v58, %v1157_v59 }
 0xf2e   :  { %v1149_v56 = vmul.f32 %v1719_v24, %v1148_v53 }
 0xf30   :  { %v1153_v57 = vsel %vm1152_vm7, %v1719_v24, %v1149_v56 }
 0xf31   :  { %v1155_v34 = vmul.f32 %v1153_v57, %v1121_v39  ;;  %v1304_v57 = vpack.c.bf16 %v1303_v55, %v1303_v55 }
 0xf33   :  { %v1158_v33 = vmul.f32 %v1624_v54, %v1155_v34 }
 0xf35   :  { %v1161_v63 = vadd.f32 %v1625_v58, %v1158_v33 }
 0xf37   :  { %v1162_v1 = vpack.c.bf16 %v1161_v63, %v1160_v62 }
 0xf39   :  { %1496 = vmatmul.msk.bf16.vlgmr.msrb.gmra.mxu3 %vm110_vm0, %v1162_v1  ;;  %v1353_v1 = vld [vmem:[#allocation5 + $0x48] sm:$0xff] }
 0xf3a   :  { %v1357_v5 = vpack.c.bf16 %v1354_v2, %v1353_v1 }
 0xf3c   :  { %1367 = vmatpush.bf16.msra.mxu1 %v1357_v5 }
 0xf40   :  { %1368 = vmatpush.bf16.msra.mxu1 %v1356_v8 }
 0xfbc   :  { %v1188_v11 = vpop.f32.mrf.mxu3 }
 0xfbd   :  { %v1189_v12 = vadd.f32 %v1626_v10, %v1188_v11 }
 0xfbf   :  { %v1497_v16 = vmul.f32 -1.702, %v1189_v12 }
 0xfc1   :  { %v1197_v18 = vmul.f32 1.442695, %v1497_v16 }
 0xfc3   :  { %1720 = vpow2.f32 %v1197_v18 }
 0xfc4   :  { %v1190_v19 = vpop.f32.mrf.mxu3 }
 0xfc5   :  { %v1191_v20 = vadd.f32 %v1626_v10, %v1190_v19 }
 0xfc7   :  { %v1498_v15 = vmul.f32 -1.702, %v1191_v20 }
 0xfc9   :  { %v1721_v13 = vpop.eup %1720  ;;  %v1199_v22 = vmul.f32 1.442695, %v1498_v15 }
 0xfca   :  { %v1201_v23 = vadd.f32 1.0, %v1721_v13 }
 0xfcb   :  { %1722 = vpow2.f32 %v1199_v22  ;;  %v1629_v22 = vld [vmem:[#allocation5 + $0x31] ss:$0 sm:$0xff] }
 0xfcc   :  { %1724 = vrcp.f32 %v1201_v23  ;;  %v1214_v32 = vand.u32 2147483648, %v1201_v23  ;;  %vm1208_vm12 = vweird.f32 %v1201_v23  ;;  %v1212_v36 = vand.u32 2147483647, %v1201_v23 }
 0xfce   :  { %v1215_v42 = vor.u32 1.1754944e-38, %v1214_v32  ;;  %vm1213_vm15 = vcmp.eq.f32.partialorder %v1212_v36, 8.507059e+37 }
 0xfd1   :  { %v1723_v26 = vpop.eup %1722 }
 0xfd2   :  { %v1725_v27 = vpop.eup %1724  ;;  %v1202_v28 = vadd.f32 1.0, %v1723_v26 }
 0xfd3   :  { %v1204_v35 = vmul.f32 %v1725_v27, %v1201_v23  ;;  %vm1209_vm11 = vweird.f32 %v1725_v27 }
 0xfd4   :  { %1726 = vrcp.f32 %v1202_v28  ;;  %vm1210_vm13 = vmor %vm1208_vm12, %vm1209_vm11  ;;  %v1229_v9 = vand.u32 2147483648, %v1202_v28  ;;  %v1227_v41 = vand.u32 2147483647, %v1202_v28  ;;  %vm1223_vm1 = vweird.f32 %v1202_v28 }
 0xfd5   :  { %v1205_v29 = vsub.f32 1.0, %v1204_v35 }
 0xfd6   :  { %v1230_v44 = vor.u32 1.1754944e-38, %v1229_v9  ;;  %vm1228_vm3 = vcmp.eq.f32.partialorder %v1227_v41, 8.507059e+37 }
 0xfd7   :  { %v1206_v30 = vmul.f32 %v1725_v27, %v1205_v29 }
 0xfd9   :  { %v1207_v4 = vadd.f32 %v1725_v27, %v1206_v30 }
 0xfda   :  { %v1727_v31 = vpop.eup %1726 }
 0xfdb   :  { %v1219_v39 = vmul.f32 %v1727_v31, %v1202_v28  ;;  %v1211_v38 = vsel %vm1210_vm13, %v1725_v27, %v1207_v4  ;;  %vm1224_vm14 = vweird.f32 %v1727_v31 }
 0xfdc   :  { %v1216_v43 = vsel %vm1213_vm15, %v1215_v42, %v1211_v38  ;;  %vm1225_vm2 = vmor %vm1223_vm1, %vm1224_vm14 }
 0xfdd   :  { %v1220_v37 = vsub.f32 1.0, %v1219_v39  ;;  %v1233_v0 = vmul.f32 %v1216_v43, %v1189_v12 }
 0xfdf   :  { %v1221_v40 = vmul.f32 %v1727_v31, %v1220_v37 }
 0xfe1   :  { %v1222_v60 = vadd.f32 %v1727_v31, %v1221_v40 }
 0xfe3   :  { %v1226_v45 = vsel %vm1225_vm2, %v1727_v31, %v1222_v60 }
 0xfe4   :  { %v1231_v46 = vsel %vm1228_vm3, %v1230_v44, %v1226_v45 }
 0xfe5   :  { %v1234_v47 = vmul.f32 %v1231_v46, %v1191_v20  ;;  %v1628_v20 = vld [vmem:[#allocation5 + $0x30] ss:$0 sm:$0xff] }
 0xfe7   :  { %v1235_v24 = vpack.c.bf16 %v1234_v47, %v1233_v0 }
 0xfe9   :  { %1292 = vmatmul.bf16.vlgmr.msrb.gmra.mxu2 %v1235_v24 }
0x106c   :  { %v1293_v48 = vpop.f32.mrf.mxu2 }
0x106d   :  { %v1298_v49 = vadd.f32 %v1293_v48, %v2091_v21 }
0x106f   :  { %v1301_v53 = vadd.f32 %v1627_v50, %v1298_v49 }
0x1074   :  { %v1295_v51 = vpop.f32.mrf.mxu2 }
0x1075   :  { %v1299_v52 = vadd.f32 %v1295_v51, %v2096_v25 }
0x1077   :  { %v1302_v54 = vadd.f32 %v1627_v50, %v1299_v52 }
0x1079   :  { %v1305_v56 = vpack.c.bf16 %v1302_v54, %v1301_v53 }
0x107b   :  { %1316 = vmatpush.bf16.msra.mxu0 %v1305_v56 }
0x107e   :  { %1531 = vmatmul.msk.bf16.vlgmr.msra.gmra.mxu0 %vm228_vm9, %v1304_v57 }
0x10fb   :  { %v1318_v58 = vpop.f32.mrf.mxu0 }
0x10fc   :  { %v1325_v59 = vsel %vm1324_vm8, %v1318_v58, 0.0 }
0x10fd   :  { %1326 = vadd.xlane.f32.xlu1 %v1325_v59 }
0x1103   :  { %v1320_v21 = vpop.f32.mrf.mxu0 }
0x1170   :  { %v1327_v34 = vpop.xlane.xlu1 %1326 }
0x1171   :  { %v1328_v25 = vmul.f32 %v1327_v34, %v1899_v14 }
0x1173   :  { %v1329_v33 = vsub.f32 %v1318_v58, %v1328_v25 }
0x1175   :  { %v1330_v62 = vmul.f32 %v1329_v33, %v1329_v33 }
0x1177   :  { %v1331_v63 = vsel %vm1324_vm8, %v1330_v62, 0.0 }
0x1178   :  { %1332 = vadd.xlane.f32.xlu2 %v1331_v63 }
0x11eb   :  { %v1333_v10 = vpop.xlane.xlu2 %1332 }
0x11ec   :  { %v1334_v11 = vmul.f32 %v1333_v10, %v1899_v14 }
0x11ee   :  { %v1335_v6 = vadd.f32 1e-05, %v1334_v11 }
0x11f0   :  { %1728 = vrsqrt.f32 %v1335_v6  ;;  %vm1342_vm10 = vweird.f32 %v1335_v6 }
0x11f6   :  { %v1729_v12 = vpop.eup %1728 }
0x11f7   :  { %v1337_v16 = vmul.f32 %v1729_v12, %v1335_v6  ;;  %vm1343_vm9 = vweird.f32 %v1729_v12 }
0x11f8   :  { %vm1344_vm4 = vmor %vm1342_vm10, %vm1343_vm9 }
0x11f9   :  { %v1338_v17 = vmul.f32 %v1729_v12, %v1337_v16 }
0x11fb   :  { %v1339_v18 = vmul.f32 0.5, %v1338_v17 }
0x11fd   :  { %v1340_v19 = vsub.f32 1.5, %v1339_v18 }
0x11ff   :  { %v1341_v61 = vmul.f32 %v1729_v12, %v1340_v19 }
0x1201   :  { %v1345_v15 = vsel %vm1344_vm4, %v1729_v12, %v1341_v61 }
0x1202   :  { %v1346_v13 = vmul.f32 %v1345_v15, %v1329_v33 }
0x1204   :  { %v1348_v23 = vmul.f32 %v1628_v20, %v1346_v13 }
0x1206   :  { %v1350_v26 = vadd.f32 %v1629_v22, %v1348_v23 }
0x1208   :  { %v1355_v27 = vpack.c.bf16 %v1350_v26, %v1350_v26 }
0x120a   :  { %1532 = vmatmul.msk.bf16.vlgmr.msra.gmra.mxu1 %vm110_vm0, %v1355_v27 }
0x1287   :  { %v1370_v14 = vpop.f32.mrf.mxu1 }
0x1288   :  { %1374 = vst.msk [vmem:[#allocation8] sm:$0x3] %vm1324_vm8, %v1370_v14 }
0x1289   :  { %1385 = dma.vmem_to_hbm [thread:$0]  %s1381_s19, 32, %s1383_s22, [#allocation4]  }
0x128f   :  { %v1372_v28 = vpop.f32.mrf.mxu1 }
0x1290   :  { %1830 = dma.done.wait [#allocation4], 32  }
0x1291   :  { %1831 = vsyncadd [#allocation4], 4294967264 }
0x1292   :  { %1390 = vsyncpa [#allocation3], 1 }
0x1293   :  { %1391 = vsyncpa [#allocation6], 1 }
0x1294   :  { %1392 = vsyncpa [#allocation4], 1 }

</bundles_post_ra>
